<compile_context>
chip_gen: v7x
topology: tpu7x:2x2x1
jax: 0.10.0
libtpu: 0.0.40
codegen_flags: <defaults>
</compile_context>

<pallas_src>
import functools
import math

import jax
import jax.numpy as jnp
from jax.experimental import pallas as pl
from jax.experimental.pallas import tpu as pltpu


# ----------------------------------------------------------------------------
# Fused Pallas kernel: linearIn + ReLU + stacked LSTM (one layer / grid step)
# + linearOut.  H here is the lane-padded hidden size (multiple of 128).
# ----------------------------------------------------------------------------
def _slstm_fused_kernel(x_ref, w_in_ref, b_in_ref,
                        w_ih_ref, w_hh_ref, b_l_ref,
                        w_out_ref, b_out_ref,
                        o_ref,
                        act_scr, gx_scr, h_scr, c_scr,
                        *, T, B, H, TC, matmul_dtype):
    l = pl.program_id(0)
    n_layers = pl.num_programs(0)

    def mm(a, b):
        # Big non-recurrent matmuls; optionally bf16 MXU inputs, f32 accumulate.
        if matmul_dtype != jnp.float32:
            a = a.astype(matmul_dtype)
            b = b.astype(matmul_dtype)
        return jnp.dot(a, b, preferred_element_type=jnp.float32)

    # ---- layer 0 only: linearIn + ReLU over the whole flattened sequence
    @pl.when(l == 0)
    def _():
        a = mm(x_ref[...], w_in_ref[...]) + b_in_ref[...]
        act_scr[...] = jnp.maximum(a, 0.0)                 # (T*B, H)

    # ---- LSTM layer l (weights for this layer streamed in by the BlockSpecs)
    h_scr[...] = jnp.zeros_like(h_scr)
    c_scr[...] = jnp.zeros_like(c_scr)

    n_chunks = (T + TC - 1) // TC
    for ck in range(n_chunks):                             # static Python loop
        t0 = ck * TC
        tc_len = min(TC, T - t0)
        rows = tc_len * B

        # Non-recurrent part of the gates for this time chunk: one MXU matmul.
        gx_scr[pl.ds(0, rows), :] = (
            mm(act_scr[pl.ds(t0 * B, rows), :], w_ih_ref[...]) + b_l_ref[...])

        # TODO(synk): could hold w_hh in MXU weight regs across the T loop via
        # pltpu.matmul_push_rhs / matmul_acc_lhs / matmul_pop.
        def step(t, carry):
            row = pl.multiple_of(t * B, B)                 # sublane-aligned
            g = gx_scr[pl.ds(row, B), :] + jnp.dot(
                h_scr[...], w_hh_ref[...], preferred_element_type=jnp.float32)
            # H is a multiple of 128 -> each gate slice is vreg (lane) aligned.
            i = jax.nn.sigmoid(g[:, 0 * H:1 * H])
            f = jax.nn.sigmoid(g[:, 1 * H:2 * H])
            gg = jnp.tanh(g[:, 2 * H:3 * H])
            o = jax.nn.sigmoid(g[:, 3 * H:4 * H])
            c = f * c_scr[...] + i * gg
            h = o * jnp.tanh(c)
            c_scr[...] = c
            h_scr[...] = h
            dst = pl.multiple_of(t0 * B + t * B, B)
            # Layer output overwrites the activation slab in place (VMEM only).
            act_scr[pl.ds(dst, B), :] = h
            return carry

        jax.lax.fori_loop(0, tc_len, step, 0,
                          unroll=max(1, min(8, tc_len)))

    # ---- last layer only: linearOut, single lane-dense HBM writeback
    @pl.when(l == n_layers - 1)
    def _():
        y = mm(act_scr[...], w_out_ref[...]) + b_out_ref[...]
        o_ref[...] = y.astype(o_ref.dtype)


# ----------------------------------------------------------------------------
# Parameter init (deterministic, PyTorch-style uniform(-k, k))
# ----------------------------------------------------------------------------
def init_params(key, input_size, output_size, hidden_size, num_layers):
    ks = jax.random.split(key, 4 + 4 * num_layers)
    kin = 1.0 / math.sqrt(input_size)
    kh = 1.0 / math.sqrt(hidden_size)

    def u(k, shape, bound):
        return jax.random.uniform(k, shape, jnp.float32, -bound, bound)

    params = {
        "w_in": u(ks[0], (input_size, hidden_size), kin),    # linearIn.weight^T
        "b_in": u(ks[1], (hidden_size,), kin),
        "w_out": u(ks[2], (hidden_size, output_size), kh),   # linearOut.weight^T
        "b_out": u(ks[3], (output_size,), kh),
        "lstm": [],
    }
    for layer in range(num_layers):
        in_dim = hidden_size  # LSTM input is hidden_size for all layers here
        kk = ks[4 + 4 * layer:4 + 4 * (layer + 1)]
        params["lstm"].append({
            "w_ih_t": u(kk[0], (in_dim, 4 * hidden_size), kh),
            "w_hh_t": u(kk[1], (hidden_size, 4 * hidden_size), kh),
            "b": u(kk[2], (4 * hidden_size,), kh) + u(kk[3], (4 * hidden_size,), kh),
        })
    return params


# ----------------------------------------------------------------------------
# Forward pass (single fused Pallas kernel, grid over LSTM layers)
# ----------------------------------------------------------------------------
def _round_up(n, m):
    return ((n + m - 1) // m) * m


def slstm_forward(x, params, *, matmul_dtype=jnp.float32, time_chunk=64):
    # TODO(synk): inter-layer dropout omitted (module default dropout=0.0).
    # TODO(synk): on v7x, a leading "parallel" grid axis over batch halves
    #             would use the second TensorCore (needs padded batch >= 16).
    T, B, Din = x.shape
    H = params["w_in"].shape[1]
    Dout = params["w_out"].shape[1]
    L = len(params["lstm"])

    # Host-side zero padding (exact semantics preserved: padded weight rows/cols
    # and biases are zero, so padded hidden lanes stay exactly 0 through the
    # recurrence; padded batch rows / output lanes are sliced off at the end).
    Bp = _round_up(B, 8)                 # sublane-aligned batch
    Dinp = max(8, _round_up(Din, 8))     # input feature dim
    Hp = _round_up(H, 128)               # lane-dense hidden dim
    DoutP = _round_up(Dout, 128)         # lane-dense output dim
    N = T * Bp
    TC = max(1, min(T, time_chunk))      # time-chunk for the gate precompute

    x_p = jnp.pad(x, ((0, 0), (0, Bp - B), (0, Dinp - Din))).reshape(N, Dinp)
    w_in_p = jnp.pad(params["w_in"], ((0, Dinp - Din), (0, Hp - H)))
    b_in_p = jnp.pad(params["b_in"], (0, Hp - H)).reshape(1, Hp)
    w_out_p = jnp.pad(params["w_out"], ((0, Hp - H), (0, DoutP - Dout)))
    b_out_p = jnp.pad(params["b_out"], (0, DoutP - Dout)).reshape(1, DoutP)

    def pad_gates(w, pad_rows):
        # Per-gate zero pad of the trailing (4H) gate axis to (4Hp), keeping the
        # PyTorch i|f|g|o layout aligned to the padded hidden size.
        parts = []
        for k in range(4):
            p = w[..., k * H:(k + 1) * H]
            pad = [(0, 0)] * (w.ndim - 1) + [(0, Hp - H)]
            parts.append(jnp.pad(p, pad))
        out = jnp.concatenate(parts, axis=-1)
        if pad_rows:
            out = jnp.pad(out, ((0, Hp - H), (0, 0)))
        return out

    w_ih_all = jnp.stack([pad_gates(lp["w_ih_t"], True) for lp in params["lstm"]])   # (L, Hp, 4Hp)
    w_hh_all = jnp.stack([pad_gates(lp["w_hh_t"], True) for lp in params["lstm"]])   # (L, Hp, 4Hp)
    b_all = jnp.stack([pad_gates(lp["b"].reshape(1, 4 * H), False)
                       for lp in params["lstm"]])                                    # (L, 1, 4Hp)

    # VMEM budget: scratch + (double-buffered) streamed inputs + output.
    f32 = 4
    scratch_bytes = f32 * (N * Hp + TC * Bp * 4 * Hp + 2 * Bp * Hp)
    io_bytes = f32 * (N * Dinp + Dinp * Hp + Hp
                      + 2 * (2 * Hp * 4 * Hp + 4 * Hp)     # per-layer weights, 2 buffers
                      + Hp * DoutP + DoutP + N * DoutP)
    vmem_limit = int(min(100 * (1 << 20),
                         max(32 * (1 << 20), 2 * (scratch_bytes + io_bytes))))

    kernel = functools.partial(_slstm_fused_kernel, T=T, B=Bp, H=Hp, TC=TC,
                               matmul_dtype=matmul_dtype)

    out_flat = pl.pallas_call(
        kernel,
        out_shape=jax.ShapeDtypeStruct((N, DoutP), x.dtype),
        grid=(L,),
        in_specs=[
            pl.BlockSpec((N, Dinp), lambda l: (0, 0)),            # x (resident)
            pl.BlockSpec((Dinp, Hp), lambda l: (0, 0)),           # w_in
            pl.BlockSpec((1, Hp), lambda l: (0, 0)),              # b_in
            pl.BlockSpec((None, Hp, 4 * Hp), lambda l: (l, 0, 0)),   # w_ih[l]
            pl.BlockSpec((None, Hp, 4 * Hp), lambda l: (l, 0, 0)),   # w_hh[l]
            pl.BlockSpec((None, 1, 4 * Hp), lambda l: (l, 0, 0)),    # b[l]
            pl.BlockSpec((Hp, DoutP), lambda l: (0, 0)),          # w_out
            pl.BlockSpec((1, DoutP), lambda l: (0, 0)),           # b_out
        ],
        out_specs=pl.BlockSpec((N, DoutP), lambda l: (0, 0)),
        scratch_shapes=[
            pltpu.VMEM((N, Hp), jnp.float32),          # activation / h slab
            pltpu.VMEM((TC * Bp, 4 * Hp), jnp.float32),  # gate x-projection (per chunk)
            pltpu.VMEM((Bp, Hp), jnp.float32),         # h carry
            pltpu.VMEM((Bp, Hp), jnp.float32),         # c carry
        ],
        compiler_params=pltpu.CompilerParams(
            dimension_semantics=("arbitrary",),        # layers are sequential
            vmem_limit_bytes=vmem_limit),
    )(x_p, w_in_p, b_in_p, w_ih_all, w_hh_all, b_all, w_out_p, b_out_p)

    return out_flat.reshape(T, Bp, DoutP)[:, :B, :Dout]


# ----------------------------------------------------------------------------
# Pure-JAX reference (for correctness check)
# ----------------------------------------------------------------------------
def slstm_reference(x, params):
    T, B, Din = x.shape
    H = params["w_in"].shape[1]
    x0 = jax.nn.relu(x @ params["w_in"] + params["b_in"])

    h_seq = x0
    for lp in params["lstm"]:
        def step(carry, x_t, lp=lp):
            h, c = carry
            gates = x_t @ lp["w_ih_t"] + h @ lp["w_hh_t"] + lp["b"]
            i = jax.nn.sigmoid(gates[:, 0 * H:1 * H])
            f = jax.nn.sigmoid(gates[:, 1 * H:2 * H])
            g = jnp.tanh(gates[:, 2 * H:3 * H])
            o = jax.nn.sigmoid(gates[:, 3 * H:4 * H])
            c = f * c + i * g
            h = o * jnp.tanh(c)
            return (h, c), h

        init = (jnp.zeros((B, H), jnp.float32), jnp.zeros((B, H), jnp.float32))
        _, h_seq = jax.lax.scan(step, init, h_seq)

    return h_seq @ params["w_out"] + params["b_out"]


# ----------------------------------------------------------------------------
if __name__ == "__main__":
    input_size, output_size, hidden_size, num_layers = 5, 1, 32, 2
    T, B = 8, 4

    key = jax.random.PRNGKey(0)
    kx, kp = jax.random.split(key)
    x = jax.random.normal(kx, (T, B, input_size), jnp.float32)
    params = init_params(kp, input_size, output_size, hidden_size, num_layers)

    out = jax.block_until_ready(slstm_forward(x, params))
    ref = jax.block_until_ready(slstm_reference(x, params))

    assert out.shape == (T, B, output_size), out.shape
    assert jnp.allclose(out, ref, atol=2e-5, rtol=2e-5), \
        float(jnp.max(jnp.abs(out - ref)))

    print("KERNEL_OK")
</pallas_src>

<mosaic_0001>
module attributes {stable_mosaic.version = 11 : i64} {
  func.func @_slstm_fused_kernel(%arg0: i32, %arg1: memref<64x8xf32, #tpu.memory_space<vmem>>, %arg2: memref<8x128xf32, #tpu.memory_space<vmem>>, %arg3: memref<1x128xf32, #tpu.memory_space<vmem>>, %arg4: memref<1x128x512xf32, #tpu.memory_space<vmem>>, %arg5: memref<1x128x512xf32, #tpu.memory_space<vmem>>, %arg6: memref<1x1x512xf32, #tpu.memory_space<vmem>>, %arg7: memref<128x128xf32, #tpu.memory_space<vmem>>, %arg8: memref<1x128xf32, #tpu.memory_space<vmem>>, %arg9: memref<64x128xf32, #tpu.memory_space<vmem>>, %arg10: memref<64x128xf32, #tpu.memory_space<vmem>>, %arg11: memref<64x512xf32, #tpu.memory_space<vmem>>, %arg12: memref<8x128xf32, #tpu.memory_space<vmem>>, %arg13: memref<8x128xf32, #tpu.memory_space<vmem>>) attributes {dimension_semantics = [#tpu.dimension_semantics<arbitrary>], iteration_bounds = array<i64: 2>, scalar_prefetch = 0 : i64, scratch_operands = 4 : i64, tpu.core_type = #tpu.core_type<tc>, window_params = [{pipeline_mode = #tpu.pipeline_mode<synchronous>, transform_indices = @transform_0, window_bounds = array<i64: 64, 8>}, {pipeline_mode = #tpu.pipeline_mode<synchronous>, transform_indices = @transform_1, window_bounds = array<i64: 8, 128>}, {pipeline_mode = #tpu.pipeline_mode<synchronous>, transform_indices = @transform_2, window_bounds = array<i64: 1, 128>}, {transform_indices = @transform_3, window_bounds = array<i64: 1, 128, 512>}, {transform_indices = @transform_4, window_bounds = array<i64: 1, 128, 512>}, {transform_indices = @transform_5, window_bounds = array<i64: 1, 1, 512>}, {pipeline_mode = #tpu.pipeline_mode<synchronous>, transform_indices = @transform_6, window_bounds = array<i64: 128, 128>}, {pipeline_mode = #tpu.pipeline_mode<synchronous>, transform_indices = @transform_7, window_bounds = array<i64: 1, 128>}, {pipeline_mode = #tpu.pipeline_mode<synchronous>, transform_indices = @transform_8, window_bounds = array<i64: 64, 128>}]} {
    %c0_i32 = arith.constant 0 : i32
    %0 = arith.cmpi eq, %arg0, %c0_i32 : i32
    %1 = arith.extui %0 : i1 to i32
    %c0_i32_0 = arith.constant 0 : i32
    %2 = arith.cmpi ne, %1, %c0_i32_0 : i32
    scf.if %2 {
      %c0_179 = arith.constant 0 : index
      %c0_180 = arith.constant 0 : index
      %355 = vector.load %arg1[%c0_179, %c0_180] : memref<64x8xf32, #tpu.memory_space<vmem>>, vector<64x8xf32>
      %c0_181 = arith.constant 0 : index
      %c0_182 = arith.constant 0 : index
      %356 = vector.load %arg2[%c0_181, %c0_182] : memref<8x128xf32, #tpu.memory_space<vmem>>, vector<8x128xf32>
      %cst_183 = arith.constant dense<0.000000e+00> : vector<64x128xf32>
      %357 = tpu.matmul %355, %356, %cst_183 {dimension_numbers = #tpu.dot_dimension_numbers<[1], [0], [0], [1], [0, 0, 1, 1], [], []>} : vector<64x8xf32>, vector<8x128xf32>, vector<64x128xf32> -> vector<64x128xf32>
      %c0_184 = arith.constant 0 : index
      %c0_185 = arith.constant 0 : index
      %358 = vector.load %arg3[%c0_184, %c0_185] : memref<1x128xf32, #tpu.memory_space<vmem>>, vector<1x128xf32>
      %359 = vector.broadcast %358 : vector<1x128xf32> to vector<64x128xf32>
      %360 = arith.addf %357, %359 : vector<64x128xf32>
      %cst_186 = arith.constant 0.000000e+00 : f32
      %361 = vector.broadcast %cst_186 : f32 to vector<64x128xf32>
      %362 = arith.maximumf %360, %361 : vector<64x128xf32>
      %c0_187 = arith.constant 0 : index
      %c0_188 = arith.constant 0 : index
      %363 = vector.load %arg10[%c0_187, %c0_188] : memref<64x128xf32, #tpu.memory_space<vmem>>, vector<64x128xf32>
      tpu.vector_store %arg10[%c0_187, %c0_188], %362 {strides = array<i32>} : memref<64x128xf32, #tpu.memory_space<vmem>>, vector<64x128xf32>,
    } else {
    }
    %cst = arith.constant 0.000000e+00 : f32
    %3 = vector.broadcast %cst : f32 to vector<8x128xf32>
    %c0 = arith.constant 0 : index
    %c0_1 = arith.constant 0 : index
    %4 = vector.load %arg12[%c0, %c0_1] : memref<8x128xf32, #tpu.memory_space<vmem>>, vector<8x128xf32>
    tpu.vector_store %arg12[%c0, %c0_1], %3 {strides = array<i32>} : memref<8x128xf32, #tpu.memory_space<vmem>>, vector<8x128xf32>,
    %cst_2 = arith.constant 0.000000e+00 : f32
    %5 = vector.broadcast %cst_2 : f32 to vector<8x128xf32>
    %c0_3 = arith.constant 0 : index
    %c0_4 = arith.constant 0 : index
    %6 = vector.load %arg13[%c0_3, %c0_4] : memref<8x128xf32, #tpu.memory_space<vmem>>, vector<8x128xf32>
    tpu.vector_store %arg13[%c0_3, %c0_4], %5 {strides = array<i32>} : memref<8x128xf32, #tpu.memory_space<vmem>>, vector<8x128xf32>,
    %c0_5 = arith.constant 0 : index
    %c0_6 = arith.constant 0 : index
    %7 = vector.load %arg10[%c0_5, %c0_6] : memref<64x128xf32, #tpu.memory_space<vmem>>, vector<64x128xf32>
    %c0_7 = arith.constant 0 : index
    %c0_8 = arith.constant 0 : index
    %c0_9 = arith.constant 0 : index
    %8 = vector.load %arg4[%c0_7, %c0_8, %c0_9] : memref<1x128x512xf32, #tpu.memory_space<vmem>>, vector<1x128x512xf32>
    %9 = vector.shape_cast %8 : vector<1x128x512xf32> to vector<128x512xf32>
    %cst_10 = arith.constant dense<0.000000e+00> : vector<64x512xf32>
    %10 = tpu.matmul %7, %9, %cst_10 {dimension_numbers = #tpu.dot_dimension_numbers<[1], [0], [0], [1], [0, 0, 1, 1], [], []>} : vector<64x128xf32>, vector<128x512xf32>, vector<64x512xf32> -> vector<64x512xf32>
    %c0_11 = arith.constant 0 : index
    %c0_12 = arith.constant 0 : index
    %c0_13 = arith.constant 0 : index
    %11 = vector.load %arg6[%c0_11, %c0_12, %c0_13] : memref<1x1x512xf32, #tpu.memory_space<vmem>>, vector<1x1x512xf32>
    %12 = vector.shape_cast %11 : vector<1x1x512xf32> to vector<1x512xf32>
    %13 = vector.broadcast %12 : vector<1x512xf32> to vector<64x512xf32>
    %14 = arith.addf %10, %13 : vector<64x512xf32>
    %c0_14 = arith.constant 0 : index
    %c0_15 = arith.constant 0 : index
    %15 = vector.load %arg11[%c0_14, %c0_15] : memref<64x512xf32, #tpu.memory_space<vmem>>, vector<64x512xf32>
    tpu.vector_store %arg11[%c0_14, %c0_15], %14 {strides = array<i32>} : memref<64x512xf32, #tpu.memory_space<vmem>>, vector<64x512xf32>,
    %c0_i32_16 = arith.constant 0 : i32
    %c8_i32 = arith.constant 8 : i32
    %16 = arith.muli %c0_i32_16, %c8_i32 : i32
    %17 = tpu.assume_multiple %16, 8 : i32
    %18 = arith.index_cast %17 : i32 to index
    %c0_17 = arith.constant 0 : index
    %19 = vector.load %arg11[%18, %c0_17] : memref<64x512xf32, #tpu.memory_space<vmem>>, vector<8x512xf32>
    %c0_18 = arith.constant 0 : index
    %c0_19 = arith.constant 0 : index
    %20 = vector.load %arg12[%c0_18, %c0_19] : memref<8x128xf32, #tpu.memory_space<vmem>>, vector<8x128xf32>
    %c0_20 = arith.constant 0 : index
    %c0_21 = arith.constant 0 : index
    %c0_22 = arith.constant 0 : index
    %21 = vector.load %arg5[%c0_20, %c0_21, %c0_22] : memref<1x128x512xf32, #tpu.memory_space<vmem>>, vector<1x128x512xf32>
    %22 = vector.shape_cast %21 : vector<1x128x512xf32> to vector<128x512xf32>
    %cst_23 = arith.constant dense<0.000000e+00> : vector<8x512xf32>
    %23 = tpu.matmul %20, %22, %cst_23 {dimension_numbers = #tpu.dot_dimension_numbers<[1], [0], [0], [1], [0, 0, 1, 1], [], []>} : vector<8x128xf32>, vector<128x512xf32>, vector<8x512xf32> -> vector<8x512xf32>
    %24 = arith.addf %19, %23 : vector<8x512xf32>
    %25 = vector.extract_strided_slice %24 {offsets = [0, 0], sizes = [8, 128], strides = [1, 1]} : vector<8x512xf32> to vector<8x128xf32>
    %26 = arith.negf %25 : vector<8x128xf32>
    %27 = math.exp %26 : vector<8x128xf32>
    %cst_24 = arith.constant 1.000000e+00 : f32
    %28 = vector.broadcast %cst_24 : f32 to vector<8x128xf32>
    %29 = arith.addf %28, %27 : vector<8x128xf32>
    %30 = arith.divf %28, %29 : vector<8x128xf32>
    %31 = vector.extract_strided_slice %24 {offsets = [0, 128], sizes = [8, 128], strides = [1, 1]} : vector<8x512xf32> to vector<8x128xf32>
    %32 = arith.negf %31 : vector<8x128xf32>
    %33 = math.exp %32 : vector<8x128xf32>
    %cst_25 = arith.constant 1.000000e+00 : f32
    %34 = vector.broadcast %cst_25 : f32 to vector<8x128xf32>
    %35 = arith.addf %34, %33 : vector<8x128xf32>
    %36 = arith.divf %34, %35 : vector<8x128xf32>
    %37 = vector.extract_strided_slice %24 {offsets = [0, 256], sizes = [8, 128], strides = [1, 1]} : vector<8x512xf32> to vector<8x128xf32>
    %38 = math.tanh %37 : vector<8x128xf32>
    %39 = vector.extract_strided_slice %24 {offsets = [0, 384], sizes = [8, 128], strides = [1, 1]} : vector<8x512xf32> to vector<8x128xf32>
    %40 = arith.negf %39 : vector<8x128xf32>
    %41 = math.exp %40 : vector<8x128xf32>
    %cst_26 = arith.constant 1.000000e+00 : f32
    %42 = vector.broadcast %cst_26 : f32 to vector<8x128xf32>
    %43 = arith.addf %42, %41 : vector<8x128xf32>
    %44 = arith.divf %42, %43 : vector<8x128xf32>
    %c0_27 = arith.constant 0 : index
    %c0_28 = arith.constant 0 : index
    %45 = vector.load %arg13[%c0_27, %c0_28] : memref<8x128xf32, #tpu.memory_space<vmem>>, vector<8x128xf32>
    %46 = arith.mulf %36, %45 : vector<8x128xf32>
    %47 = arith.mulf %30, %38 : vector<8x128xf32>
    %48 = arith.addf %46, %47 : vector<8x128xf32>
    %49 = math.tanh %48 : vector<8x128xf32>
    %50 = arith.mulf %44, %49 : vector<8x128xf32>
    %c0_29 = arith.constant 0 : index
    %c0_30 = arith.constant 0 : index
    %51 = vector.load %arg13[%c0_29, %c0_30] : memref<8x128xf32, #tpu.memory_space<vmem>>, vector<8x128xf32>
    tpu.vector_store %arg13[%c0_29, %c0_30], %48 {strides = array<i32>} : memref<8x128xf32, #tpu.memory_space<vmem>>, vector<8x128xf32>,
    %c0_31 = arith.constant 0 : index
    %c0_32 = arith.constant 0 : index
    %52 = vector.load %arg12[%c0_31, %c0_32] : memref<8x128xf32, #tpu.memory_space<vmem>>, vector<8x128xf32>
    tpu.vector_store %arg12[%c0_31, %c0_32], %50 {strides = array<i32>} : memref<8x128xf32, #tpu.memory_space<vmem>>, vector<8x128xf32>,
    %c8_i32_33 = arith.constant 8 : i32
    %53 = arith.muli %c0_i32_16, %c8_i32_33 : i32
    %c0_i32_34 = arith.constant 0 : i32
    %54 = arith.addi %c0_i32_34, %53 : i32
    %55 = tpu.assume_multiple %54, 8 : i32
    %56 = arith.index_cast %55 : i32 to index
    %c0_35 = arith.constant 0 : index
    %57 = vector.load %arg10[%56, %c0_35] : memref<64x128xf32, #tpu.memory_space<vmem>>, vector<8x128xf32>
    tpu.vector_store %arg10[%56, %c0_35], %50 {strides = array<i32>} : memref<64x128xf32, #tpu.memory_space<vmem>>, vector<8x128xf32>,
    %c1_i32 = arith.constant 1 : i32
    %c8_i32_36 = arith.constant 8 : i32
    %58 = arith.muli %c1_i32, %c8_i32_36 : i32
    %59 = tpu.assume_multiple %58, 8 : i32
    %60 = arith.index_cast %59 : i32 to index
    %c0_37 = arith.constant 0 : index
    %61 = vector.load %arg11[%60, %c0_37] : memref<64x512xf32, #tpu.memory_space<vmem>>, vector<8x512xf32>
    %c0_38 = arith.constant 0 : index
    %c0_39 = arith.constant 0 : index
    %62 = vector.load %arg12[%c0_38, %c0_39] : memref<8x128xf32, #tpu.memory_space<vmem>>, vector<8x128xf32>
    %c0_40 = arith.constant 0 : index
    %c0_41 = arith.constant 0 : index
    %c0_42 = arith.constant 0 : index
    %63 = vector.load %arg5[%c0_40, %c0_41, %c0_42] : memref<1x128x512xf32, #tpu.memory_space<vmem>>, vector<1x128x512xf32>
    %64 = vector.shape_cast %63 : vector<1x128x512xf32> to vector<128x512xf32>
    %cst_43 = arith.constant dense<0.000000e+00> : vector<8x512xf32>
    %65 = tpu.matmul %62, %64, %cst_43 {dimension_numbers = #tpu.dot_dimension_numbers<[1], [0], [0], [1], [0, 0, 1, 1], [], []>} : vector<8x128xf32>, vector<128x512xf32>, vector<8x512xf32> -> vector<8x512xf32>
    %66 = arith.addf %61, %65 : vector<8x512xf32>
    %67 = vector.extract_strided_slice %66 {offsets = [0, 0], sizes = [8, 128], strides = [1, 1]} : vector<8x512xf32> to vector<8x128xf32>
    %68 = arith.negf %67 : vector<8x128xf32>
    %69 = math.exp %68 : vector<8x128xf32>
    %cst_44 = arith.constant 1.000000e+00 : f32
    %70 = vector.broadcast %cst_44 : f32 to vector<8x128xf32>
    %71 = arith.addf %70, %69 : vector<8x128xf32>
    %72 = arith.divf %70, %71 : vector<8x128xf32>
    %73 = vector.extract_strided_slice %66 {offsets = [0, 128], sizes = [8, 128], strides = [1, 1]} : vector<8x512xf32> to vector<8x128xf32>
    %74 = arith.negf %73 : vector<8x128xf32>
    %75 = math.exp %74 : vector<8x128xf32>
    %cst_45 = arith.constant 1.000000e+00 : f32
    %76 = vector.broadcast %cst_45 : f32 to vector<8x128xf32>
    %77 = arith.addf %76, %75 : vector<8x128xf32>
    %78 = arith.divf %76, %77 : vector<8x128xf32>
    %79 = vector.extract_strided_slice %66 {offsets = [0, 256], sizes = [8, 128], strides = [1, 1]} : vector<8x512xf32> to vector<8x128xf32>
    %80 = math.tanh %79 : vector<8x128xf32>
    %81 = vector.extract_strided_slice %66 {offsets = [0, 384], sizes = [8, 128], strides = [1, 1]} : vector<8x512xf32> to vector<8x128xf32>
    %82 = arith.negf %81 : vector<8x128xf32>
    %83 = math.exp %82 : vector<8x128xf32>
    %cst_46 = arith.constant 1.000000e+00 : f32
    %84 = vector.broadcast %cst_46 : f32 to vector<8x128xf32>
    %85 = arith.addf %84, %83 : vector<8x128xf32>
    %86 = arith.divf %84, %85 : vector<8x128xf32>
    %c0_47 = arith.constant 0 : index
    %c0_48 = arith.constant 0 : index
    %87 = vector.load %arg13[%c0_47, %c0_48] : memref<8x128xf32, #tpu.memory_space<vmem>>, vector<8x128xf32>
    %88 = arith.mulf %78, %87 : vector<8x128xf32>
    %89 = arith.mulf %72, %80 : vector<8x128xf32>
    %90 = arith.addf %88, %89 : vector<8x128xf32>
    %91 = math.tanh %90 : vector<8x128xf32>
    %92 = arith.mulf %86, %91 : vector<8x128xf32>
    %c0_49 = arith.constant 0 : index
    %c0_50 = arith.constant 0 : index
    %93 = vector.load %arg13[%c0_49, %c0_50] : memref<8x128xf32, #tpu.memory_space<vmem>>, vector<8x128xf32>
    tpu.vector_store %arg13[%c0_49, %c0_50], %90 {strides = array<i32>} : memref<8x128xf32, #tpu.memory_space<vmem>>, vector<8x128xf32>,
    %c0_51 = arith.constant 0 : index
    %c0_52 = arith.constant 0 : index
    %94 = vector.load %arg12[%c0_51, %c0_52] : memref<8x128xf32, #tpu.memory_space<vmem>>, vector<8x128xf32>
    tpu.vector_store %arg12[%c0_51, %c0_52], %92 {strides = array<i32>} : memref<8x128xf32, #tpu.memory_space<vmem>>, vector<8x128xf32>,
    %c8_i32_53 = arith.constant 8 : i32
    %95 = arith.muli %c1_i32, %c8_i32_53 : i32
    %c0_i32_54 = arith.constant 0 : i32
    %96 = arith.addi %c0_i32_54, %95 : i32
    %97 = tpu.assume_multiple %96, 8 : i32
    %98 = arith.index_cast %97 : i32 to index
    %c0_55 = arith.constant 0 : index
    %99 = vector.load %arg10[%98, %c0_55] : memref<64x128xf32, #tpu.memory_space<vmem>>, vector<8x128xf32>
    tpu.vector_store %arg10[%98, %c0_55], %92 {strides = array<i32>} : memref<64x128xf32, #tpu.memory_space<vmem>>, vector<8x128xf32>,
    %c2_i32 = arith.constant 2 : i32
    %c8_i32_56 = arith.constant 8 : i32
    %100 = arith.muli %c2_i32, %c8_i32_56 : i32
    %101 = tpu.assume_multiple %100, 8 : i32
    %102 = arith.index_cast %101 : i32 to index
    %c0_57 = arith.constant 0 : index
    %103 = vector.load %arg11[%102, %c0_57] : memref<64x512xf32, #tpu.memory_space<vmem>>, vector<8x512xf32>
    %c0_58 = arith.constant 0 : index
    %c0_59 = arith.constant 0 : index
    %104 = vector.load %arg12[%c0_58, %c0_59] : memref<8x128xf32, #tpu.memory_space<vmem>>, vector<8x128xf32>
    %c0_60 = arith.constant 0 : index
    %c0_61 = arith.constant 0 : index
    %c0_62 = arith.constant 0 : index
    %105 = vector.load %arg5[%c0_60, %c0_61, %c0_62] : memref<1x128x512xf32, #tpu.memory_space<vmem>>, vector<1x128x512xf32>
    %106 = vector.shape_cast %105 : vector<1x128x512xf32> to vector<128x512xf32>
    %cst_63 = arith.constant dense<0.000000e+00> : vector<8x512xf32>
    %107 = tpu.matmul %104, %106, %cst_63 {dimension_numbers = #tpu.dot_dimension_numbers<[1], [0], [0], [1], [0, 0, 1, 1], [], []>} : vector<8x128xf32>, vector<128x512xf32>, vector<8x512xf32> -> vector<8x512xf32>
    %108 = arith.addf %103, %107 : vector<8x512xf32>
    %109 = vector.extract_strided_slice %108 {offsets = [0, 0], sizes = [8, 128], strides = [1, 1]} : vector<8x512xf32> to vector<8x128xf32>
    %110 = arith.negf %109 : vector<8x128xf32>
    %111 = math.exp %110 : vector<8x128xf32>
    %cst_64 = arith.constant 1.000000e+00 : f32
    %112 = vector.broadcast %cst_64 : f32 to vector<8x128xf32>
    %113 = arith.addf %112, %111 : vector<8x128xf32>
    %114 = arith.divf %112, %113 : vector<8x128xf32>
    %115 = vector.extract_strided_slice %108 {offsets = [0, 128], sizes = [8, 128], strides = [1, 1]} : vector<8x512xf32> to vector<8x128xf32>
    %116 = arith.negf %115 : vector<8x128xf32>
    %117 = math.exp %116 : vector<8x128xf32>
    %cst_65 = arith.constant 1.000000e+00 : f32
    %118 = vector.broadcast %cst_65 : f32 to vector<8x128xf32>
    %119 = arith.addf %118, %117 : vector<8x128xf32>
    %120 = arith.divf %118, %119 : vector<8x128xf32>
    %121 = vector.extract_strided_slice %108 {offsets = [0, 256], sizes = [8, 128], strides = [1, 1]} : vector<8x512xf32> to vector<8x128xf32>
    %122 = math.tanh %121 : vector<8x128xf32>
    %123 = vector.extract_strided_slice %108 {offsets = [0, 384], sizes = [8, 128], strides = [1, 1]} : vector<8x512xf32> to vector<8x128xf32>
    %124 = arith.negf %123 : vector<8x128xf32>
    %125 = math.exp %124 : vector<8x128xf32>
    %cst_66 = arith.constant 1.000000e+00 : f32
    %126 = vector.broadcast %cst_66 : f32 to vector<8x128xf32>
    %127 = arith.addf %126, %125 : vector<8x128xf32>
    %128 = arith.divf %126, %127 : vector<8x128xf32>
    %c0_67 = arith.constant 0 : index
    %c0_68 = arith.constant 0 : index
    %129 = vector.load %arg13[%c0_67, %c0_68] : memref<8x128xf32, #tpu.memory_space<vmem>>, vector<8x128xf32>
    %130 = arith.mulf %120, %129 : vector<8x128xf32>
    %131 = arith.mulf %114, %122 : vector<8x128xf32>
    %132 = arith.addf %130, %131 : vector<8x128xf32>
    %133 = math.tanh %132 : vector<8x128xf32>
    %134 = arith.mulf %128, %133 : vector<8x128xf32>
    %c0_69 = arith.constant 0 : index
    %c0_70 = arith.constant 0 : index
    %135 = vector.load %arg13[%c0_69, %c0_70] : memref<8x128xf32, #tpu.memory_space<vmem>>, vector<8x128xf32>
    tpu.vector_store %arg13[%c0_69, %c0_70], %132 {strides = array<i32>} : memref<8x128xf32, #tpu.memory_space<vmem>>, vector<8x128xf32>,
    %c0_71 = arith.constant 0 : index
    %c0_72 = arith.constant 0 : index
    %136 = vector.load %arg12[%c0_71, %c0_72] : memref<8x128xf32, #tpu.memory_space<vmem>>, vector<8x128xf32>
    tpu.vector_store %arg12[%c0_71, %c0_72], %134 {strides = array<i32>} : memref<8x128xf32, #tpu.memory_space<vmem>>, vector<8x128xf32>,
    %c8_i32_73 = arith.constant 8 : i32
    %137 = arith.muli %c2_i32, %c8_i32_73 : i32
    %c0_i32_74 = arith.constant 0 : i32
    %138 = arith.addi %c0_i32_74, %137 : i32
    %139 = tpu.assume_multiple %138, 8 : i32
    %140 = arith.index_cast %139 : i32 to index
    %c0_75 = arith.constant 0 : index
    %141 = vector.load %arg10[%140, %c0_75] : memref<64x128xf32, #tpu.memory_space<vmem>>, vector<8x128xf32>
    tpu.vector_store %arg10[%140, %c0_75], %134 {strides = array<i32>} : memref<64x128xf32, #tpu.memory_space<vmem>>, vector<8x128xf32>,
    %c3_i32 = arith.constant 3 : i32
    %c8_i32_76 = arith.constant 8 : i32
    %142 = arith.muli %c3_i32, %c8_i32_76 : i32
    %143 = tpu.assume_multiple %142, 8 : i32
    %144 = arith.index_cast %143 : i32 to index
    %c0_77 = arith.constant 0 : index
    %145 = vector.load %arg11[%144, %c0_77] : memref<64x512xf32, #tpu.memory_space<vmem>>, vector<8x512xf32>
    %c0_78 = arith.constant 0 : index
    %c0_79 = arith.constant 0 : index
    %146 = vector.load %arg12[%c0_78, %c0_79] : memref<8x128xf32, #tpu.memory_space<vmem>>, vector<8x128xf32>
    %c0_80 = arith.constant 0 : index
    %c0_81 = arith.constant 0 : index
    %c0_82 = arith.constant 0 : index
    %147 = vector.load %arg5[%c0_80, %c0_81, %c0_82] : memref<1x128x512xf32, #tpu.memory_space<vmem>>, vector<1x128x512xf32>
    %148 = vector.shape_cast %147 : vector<1x128x512xf32> to vector<128x512xf32>
    %cst_83 = arith.constant dense<0.000000e+00> : vector<8x512xf32>
    %149 = tpu.matmul %146, %148, %cst_83 {dimension_numbers = #tpu.dot_dimension_numbers<[1], [0], [0], [1], [0, 0, 1, 1], [], []>} : vector<8x128xf32>, vector<128x512xf32>, vector<8x512xf32> -> vector<8x512xf32>
    %150 = arith.addf %145, %149 : vector<8x512xf32>
    %151 = vector.extract_strided_slice %150 {offsets = [0, 0], sizes = [8, 128], strides = [1, 1]} : vector<8x512xf32> to vector<8x128xf32>
    %152 = arith.negf %151 : vector<8x128xf32>
    %153 = math.exp %152 : vector<8x128xf32>
    %cst_84 = arith.constant 1.000000e+00 : f32
    %154 = vector.broadcast %cst_84 : f32 to vector<8x128xf32>
    %155 = arith.addf %154, %153 : vector<8x128xf32>
    %156 = arith.divf %154, %155 : vector<8x128xf32>
    %157 = vector.extract_strided_slice %150 {offsets = [0, 128], sizes = [8, 128], strides = [1, 1]} : vector<8x512xf32> to vector<8x128xf32>
    %158 = arith.negf %157 : vector<8x128xf32>
    %159 = math.exp %158 : vector<8x128xf32>
    %cst_85 = arith.constant 1.000000e+00 : f32
    %160 = vector.broadcast %cst_85 : f32 to vector<8x128xf32>
    %161 = arith.addf %160, %159 : vector<8x128xf32>
    %162 = arith.divf %160, %161 : vector<8x128xf32>
    %163 = vector.extract_strided_slice %150 {offsets = [0, 256], sizes = [8, 128], strides = [1, 1]} : vector<8x512xf32> to vector<8x128xf32>
    %164 = math.tanh %163 : vector<8x128xf32>
    %165 = vector.extract_strided_slice %150 {offsets = [0, 384], sizes = [8, 128], strides = [1, 1]} : vector<8x512xf32> to vector<8x128xf32>
    %166 = arith.negf %165 : vector<8x128xf32>
    %167 = math.exp %166 : vector<8x128xf32>
    %cst_86 = arith.constant 1.000000e+00 : f32
    %168 = vector.broadcast %cst_86 : f32 to vector<8x128xf32>
    %169 = arith.addf %168, %167 : vector<8x128xf32>
    %170 = arith.divf %168, %169 : vector<8x128xf32>
    %c0_87 = arith.constant 0 : index
    %c0_88 = arith.constant 0 : index
    %171 = vector.load %arg13[%c0_87, %c0_88] : memref<8x128xf32, #tpu.memory_space<vmem>>, vector<8x128xf32>
    %172 = arith.mulf %162, %171 : vector<8x128xf32>
    %173 = arith.mulf %156, %164 : vector<8x128xf32>
    %174 = arith.addf %172, %173 : vector<8x128xf32>
    %175 = math.tanh %174 : vector<8x128xf32>
    %176 = arith.mulf %170, %175 : vector<8x128xf32>
    %c0_89 = arith.constant 0 : index
    %c0_90 = arith.constant 0 : index
    %177 = vector.load %arg13[%c0_89, %c0_90] : memref<8x128xf32, #tpu.memory_space<vmem>>, vector<8x128xf32>
    tpu.vector_store %arg13[%c0_89, %c0_90], %174 {strides = array<i32>} : memref<8x128xf32, #tpu.memory_space<vmem>>, vector<8x128xf32>,
    %c0_91 = arith.constant 0 : index
    %c0_92 = arith.constant 0 : index
    %178 = vector.load %arg12[%c0_91, %c0_92] : memref<8x128xf32, #tpu.memory_space<vmem>>, vector<8x128xf32>
    tpu.vector_store %arg12[%c0_91, %c0_92], %176 {strides = array<i32>} : memref<8x128xf32, #tpu.memory_space<vmem>>, vector<8x128xf32>,
    %c8_i32_93 = arith.constant 8 : i32
    %179 = arith.muli %c3_i32, %c8_i32_93 : i32
    %c0_i32_94 = arith.constant 0 : i32
    %180 = arith.addi %c0_i32_94, %179 : i32
    %181 = tpu.assume_multiple %180, 8 : i32
    %182 = arith.index_cast %181 : i32 to index
    %c0_95 = arith.constant 0 : index
    %183 = vector.load %arg10[%182, %c0_95] : memref<64x128xf32, #tpu.memory_space<vmem>>, vector<8x128xf32>
    tpu.vector_store %arg10[%182, %c0_95], %176 {strides = array<i32>} : memref<64x128xf32, #tpu.memory_space<vmem>>, vector<8x128xf32>,
    %c4_i32 = arith.constant 4 : i32
    %c8_i32_96 = arith.constant 8 : i32
    %184 = arith.muli %c4_i32, %c8_i32_96 : i32
    %185 = tpu.assume_multiple %184, 8 : i32
    %186 = arith.index_cast %185 : i32 to index
    %c0_97 = arith.constant 0 : index
    %187 = vector.load %arg11[%186, %c0_97] : memref<64x512xf32, #tpu.memory_space<vmem>>, vector<8x512xf32>
    %c0_98 = arith.constant 0 : index
    %c0_99 = arith.constant 0 : index
    %188 = vector.load %arg12[%c0_98, %c0_99] : memref<8x128xf32, #tpu.memory_space<vmem>>, vector<8x128xf32>
    %c0_100 = arith.constant 0 : index
    %c0_101 = arith.constant 0 : index
    %c0_102 = arith.constant 0 : index
    %189 = vector.load %arg5[%c0_100, %c0_101, %c0_102] : memref<1x128x512xf32, #tpu.memory_space<vmem>>, vector<1x128x512xf32>
    %190 = vector.shape_cast %189 : vector<1x128x512xf32> to vector<128x512xf32>
    %cst_103 = arith.constant dense<0.000000e+00> : vector<8x512xf32>
    %191 = tpu.matmul %188, %190, %cst_103 {dimension_numbers = #tpu.dot_dimension_numbers<[1], [0], [0], [1], [0, 0, 1, 1], [], []>} : vector<8x128xf32>, vector<128x512xf32>, vector<8x512xf32> -> vector<8x512xf32>
    %192 = arith.addf %187, %191 : vector<8x512xf32>
    %193 = vector.extract_strided_slice %192 {offsets = [0, 0], sizes = [8, 128], strides = [1, 1]} : vector<8x512xf32> to vector<8x128xf32>
    %194 = arith.negf %193 : vector<8x128xf32>
    %195 = math.exp %194 : vector<8x128xf32>
    %cst_104 = arith.constant 1.000000e+00 : f32
    %196 = vector.broadcast %cst_104 : f32 to vector<8x128xf32>
    %197 = arith.addf %196, %195 : vector<8x128xf32>
    %198 = arith.divf %196, %197 : vector<8x128xf32>
    %199 = vector.extract_strided_slice %192 {offsets = [0, 128], sizes = [8, 128], strides = [1, 1]} : vector<8x512xf32> to vector<8x128xf32>
    %200 = arith.negf %199 : vector<8x128xf32>
    %201 = math.exp %200 : vector<8x128xf32>
    %cst_105 = arith.constant 1.000000e+00 : f32
    %202 = vector.broadcast %cst_105 : f32 to vector<8x128xf32>
    %203 = arith.addf %202, %201 : vector<8x128xf32>
    %204 = arith.divf %202, %203 : vector<8x128xf32>
    %205 = vector.extract_strided_slice %192 {offsets = [0, 256], sizes = [8, 128], strides = [1, 1]} : vector<8x512xf32> to vector<8x128xf32>
    %206 = math.tanh %205 : vector<8x128xf32>
    %207 = vector.extract_strided_slice %192 {offsets = [0, 384], sizes = [8, 128], strides = [1, 1]} : vector<8x512xf32> to vector<8x128xf32>
    %208 = arith.negf %207 : vector<8x128xf32>
    %209 = math.exp %208 : vector<8x128xf32>
    %cst_106 = arith.constant 1.000000e+00 : f32
    %210 = vector.broadcast %cst_106 : f32 to vector<8x128xf32>
    %211 = arith.addf %210, %209 : vector<8x128xf32>
    %212 = arith.divf %210, %211 : vector<8x128xf32>
    %c0_107 = arith.constant 0 : index
    %c0_108 = arith.constant 0 : index
    %213 = vector.load %arg13[%c0_107, %c0_108] : memref<8x128xf32, #tpu.memory_space<vmem>>, vector<8x128xf32>
    %214 = arith.mulf %204, %213 : vector<8x128xf32>
    %215 = arith.mulf %198, %206 : vector<8x128xf32>
    %216 = arith.addf %214, %215 : vector<8x128xf32>
    %217 = math.tanh %216 : vector<8x128xf32>
    %218 = arith.mulf %212, %217 : vector<8x128xf32>
    %c0_109 = arith.constant 0 : index
    %c0_110 = arith.constant 0 : index
    %219 = vector.load %arg13[%c0_109, %c0_110] : memref<8x128xf32, #tpu.memory_space<vmem>>, vector<8x128xf32>
    tpu.vector_store %arg13[%c0_109, %c0_110], %216 {strides = array<i32>} : memref<8x128xf32, #tpu.memory_space<vmem>>, vector<8x128xf32>,
    %c0_111 = arith.constant 0 : index
    %c0_112 = arith.constant 0 : index
    %220 = vector.load %arg12[%c0_111, %c0_112] : memref<8x128xf32, #tpu.memory_space<vmem>>, vector<8x128xf32>
    tpu.vector_store %arg12[%c0_111, %c0_112], %218 {strides = array<i32>} : memref<8x128xf32, #tpu.memory_space<vmem>>, vector<8x128xf32>,
    %c8_i32_113 = arith.constant 8 : i32
    %221 = arith.muli %c4_i32, %c8_i32_113 : i32
    %c0_i32_114 = arith.constant 0 : i32
    %222 = arith.addi %c0_i32_114, %221 : i32
    %223 = tpu.assume_multiple %222, 8 : i32
    %224 = arith.index_cast %223 : i32 to index
    %c0_115 = arith.constant 0 : index
    %225 = vector.load %arg10[%224, %c0_115] : memref<64x128xf32, #tpu.memory_space<vmem>>, vector<8x128xf32>
    tpu.vector_store %arg10[%224, %c0_115], %218 {strides = array<i32>} : memref<64x128xf32, #tpu.memory_space<vmem>>, vector<8x128xf32>,
    %c5_i32 = arith.constant 5 : i32
    %c8_i32_116 = arith.constant 8 : i32
    %226 = arith.muli %c5_i32, %c8_i32_116 : i32
    %227 = tpu.assume_multiple %226, 8 : i32
    %228 = arith.index_cast %227 : i32 to index
    %c0_117 = arith.constant 0 : index
    %229 = vector.load %arg11[%228, %c0_117] : memref<64x512xf32, #tpu.memory_space<vmem>>, vector<8x512xf32>
    %c0_118 = arith.constant 0 : index
    %c0_119 = arith.constant 0 : index
    %230 = vector.load %arg12[%c0_118, %c0_119] : memref<8x128xf32, #tpu.memory_space<vmem>>, vector<8x128xf32>
    %c0_120 = arith.constant 0 : index
    %c0_121 = arith.constant 0 : index
    %c0_122 = arith.constant 0 : index
    %231 = vector.load %arg5[%c0_120, %c0_121, %c0_122] : memref<1x128x512xf32, #tpu.memory_space<vmem>>, vector<1x128x512xf32>
    %232 = vector.shape_cast %231 : vector<1x128x512xf32> to vector<128x512xf32>
    %cst_123 = arith.constant dense<0.000000e+00> : vector<8x512xf32>
    %233 = tpu.matmul %230, %232, %cst_123 {dimension_numbers = #tpu.dot_dimension_numbers<[1], [0], [0], [1], [0, 0, 1, 1], [], []>} : vector<8x128xf32>, vector<128x512xf32>, vector<8x512xf32> -> vector<8x512xf32>
    %234 = arith.addf %229, %233 : vector<8x512xf32>
    %235 = vector.extract_strided_slice %234 {offsets = [0, 0], sizes = [8, 128], strides = [1, 1]} : vector<8x512xf32> to vector<8x128xf32>
    %236 = arith.negf %235 : vector<8x128xf32>
    %237 = math.exp %236 : vector<8x128xf32>
    %cst_124 = arith.constant 1.000000e+00 : f32
    %238 = vector.broadcast %cst_124 : f32 to vector<8x128xf32>
    %239 = arith.addf %238, %237 : vector<8x128xf32>
    %240 = arith.divf %238, %239 : vector<8x128xf32>
    %241 = vector.extract_strided_slice %234 {offsets = [0, 128], sizes = [8, 128], strides = [1, 1]} : vector<8x512xf32> to vector<8x128xf32>
    %242 = arith.negf %241 : vector<8x128xf32>
    %243 = math.exp %242 : vector<8x128xf32>
    %cst_125 = arith.constant 1.000000e+00 : f32
    %244 = vector.broadcast %cst_125 : f32 to vector<8x128xf32>
    %245 = arith.addf %244, %243 : vector<8x128xf32>
    %246 = arith.divf %244, %245 : vector<8x128xf32>
    %247 = vector.extract_strided_slice %234 {offsets = [0, 256], sizes = [8, 128], strides = [1, 1]} : vector<8x512xf32> to vector<8x128xf32>
    %248 = math.tanh %247 : vector<8x128xf32>
    %249 = vector.extract_strided_slice %234 {offsets = [0, 384], sizes = [8, 128], strides = [1, 1]} : vector<8x512xf32> to vector<8x128xf32>
    %250 = arith.negf %249 : vector<8x128xf32>
    %251 = math.exp %250 : vector<8x128xf32>
    %cst_126 = arith.constant 1.000000e+00 : f32
    %252 = vector.broadcast %cst_126 : f32 to vector<8x128xf32>
    %253 = arith.addf %252, %251 : vector<8x128xf32>
    %254 = arith.divf %252, %253 : vector<8x128xf32>
    %c0_127 = arith.constant 0 : index
    %c0_128 = arith.constant 0 : index
    %255 = vector.load %arg13[%c0_127, %c0_128] : memref<8x128xf32, #tpu.memory_space<vmem>>, vector<8x128xf32>
    %256 = arith.mulf %246, %255 : vector<8x128xf32>
    %257 = arith.mulf %240, %248 : vector<8x128xf32>
    %258 = arith.addf %256, %257 : vector<8x128xf32>
    %259 = math.tanh %258 : vector<8x128xf32>
    %260 = arith.mulf %254, %259 : vector<8x128xf32>
    %c0_129 = arith.constant 0 : index
    %c0_130 = arith.constant 0 : index
    %261 = vector.load %arg13[%c0_129, %c0_130] : memref<8x128xf32, #tpu.memory_space<vmem>>, vector<8x128xf32>
    tpu.vector_store %arg13[%c0_129, %c0_130], %258 {strides = array<i32>} : memref<8x128xf32, #tpu.memory_space<vmem>>, vector<8x128xf32>,
    %c0_131 = arith.constant 0 : index
    %c0_132 = arith.constant 0 : index
    %262 = vector.load %arg12[%c0_131, %c0_132] : memref<8x128xf32, #tpu.memory_space<vmem>>, vector<8x128xf32>
    tpu.vector_store %arg12[%c0_131, %c0_132], %260 {strides = array<i32>} : memref<8x128xf32, #tpu.memory_space<vmem>>, vector<8x128xf32>,
    %c8_i32_133 = arith.constant 8 : i32
    %263 = arith.muli %c5_i32, %c8_i32_133 : i32
    %c0_i32_134 = arith.constant 0 : i32
    %264 = arith.addi %c0_i32_134, %263 : i32
    %265 = tpu.assume_multiple %264, 8 : i32
    %266 = arith.index_cast %265 : i32 to index
    %c0_135 = arith.constant 0 : index
    %267 = vector.load %arg10[%266, %c0_135] : memref<64x128xf32, #tpu.memory_space<vmem>>, vector<8x128xf32>
    tpu.vector_store %arg10[%266, %c0_135], %260 {strides = array<i32>} : memref<64x128xf32, #tpu.memory_space<vmem>>, vector<8x128xf32>,
    %c6_i32 = arith.constant 6 : i32
    %c8_i32_136 = arith.constant 8 : i32
    %268 = arith.muli %c6_i32, %c8_i32_136 : i32
    %269 = tpu.assume_multiple %268, 8 : i32
    %270 = arith.index_cast %269 : i32 to index
    %c0_137 = arith.constant 0 : index
    %271 = vector.load %arg11[%270, %c0_137] : memref<64x512xf32, #tpu.memory_space<vmem>>, vector<8x512xf32>
    %c0_138 = arith.constant 0 : index
    %c0_139 = arith.constant 0 : index
    %272 = vector.load %arg12[%c0_138, %c0_139] : memref<8x128xf32, #tpu.memory_space<vmem>>, vector<8x128xf32>
    %c0_140 = arith.constant 0 : index
    %c0_141 = arith.constant 0 : index
    %c0_142 = arith.constant 0 : index
    %273 = vector.load %arg5[%c0_140, %c0_141, %c0_142] : memref<1x128x512xf32, #tpu.memory_space<vmem>>, vector<1x128x512xf32>
    %274 = vector.shape_cast %273 : vector<1x128x512xf32> to vector<128x512xf32>
    %cst_143 = arith.constant dense<0.000000e+00> : vector<8x512xf32>
    %275 = tpu.matmul %272, %274, %cst_143 {dimension_numbers = #tpu.dot_dimension_numbers<[1], [0], [0], [1], [0, 0, 1, 1], [], []>} : vector<8x128xf32>, vector<128x512xf32>, vector<8x512xf32> -> vector<8x512xf32>
    %276 = arith.addf %271, %275 : vector<8x512xf32>
    %277 = vector.extract_strided_slice %276 {offsets = [0, 0], sizes = [8, 128], strides = [1, 1]} : vector<8x512xf32> to vector<8x128xf32>
    %278 = arith.negf %277 : vector<8x128xf32>
    %279 = math.exp %278 : vector<8x128xf32>
    %cst_144 = arith.constant 1.000000e+00 : f32
    %280 = vector.broadcast %cst_144 : f32 to vector<8x128xf32>
    %281 = arith.addf %280, %279 : vector<8x128xf32>
    %282 = arith.divf %280, %281 : vector<8x128xf32>
    %283 = vector.extract_strided_slice %276 {offsets = [0, 128], sizes = [8, 128], strides = [1, 1]} : vector<8x512xf32> to vector<8x128xf32>
    %284 = arith.negf %283 : vector<8x128xf32>
    %285 = math.exp %284 : vector<8x128xf32>
    %cst_145 = arith.constant 1.000000e+00 : f32
    %286 = vector.broadcast %cst_145 : f32 to vector<8x128xf32>
    %287 = arith.addf %286, %285 : vector<8x128xf32>
    %288 = arith.divf %286, %287 : vector<8x128xf32>
    %289 = vector.extract_strided_slice %276 {offsets = [0, 256], sizes = [8, 128], strides = [1, 1]} : vector<8x512xf32> to vector<8x128xf32>
    %290 = math.tanh %289 : vector<8x128xf32>
    %291 = vector.extract_strided_slice %276 {offsets = [0, 384], sizes = [8, 128], strides = [1, 1]} : vector<8x512xf32> to vector<8x128xf32>
    %292 = arith.negf %291 : vector<8x128xf32>
    %293 = math.exp %292 : vector<8x128xf32>
    %cst_146 = arith.constant 1.000000e+00 : f32
    %294 = vector.broadcast %cst_146 : f32 to vector<8x128xf32>
    %295 = arith.addf %294, %293 : vector<8x128xf32>
    %296 = arith.divf %294, %295 : vector<8x128xf32>
    %c0_147 = arith.constant 0 : index
    %c0_148 = arith.constant 0 : index
    %297 = vector.load %arg13[%c0_147, %c0_148] : memref<8x128xf32, #tpu.memory_space<vmem>>, vector<8x128xf32>
    %298 = arith.mulf %288, %297 : vector<8x128xf32>
    %299 = arith.mulf %282, %290 : vector<8x128xf32>
    %300 = arith.addf %298, %299 : vector<8x128xf32>
    %301 = math.tanh %300 : vector<8x128xf32>
    %302 = arith.mulf %296, %301 : vector<8x128xf32>
    %c0_149 = arith.constant 0 : index
    %c0_150 = arith.constant 0 : index
    %303 = vector.load %arg13[%c0_149, %c0_150] : memref<8x128xf32, #tpu.memory_space<vmem>>, vector<8x128xf32>
    tpu.vector_store %arg13[%c0_149, %c0_150], %300 {strides = array<i32>} : memref<8x128xf32, #tpu.memory_space<vmem>>, vector<8x128xf32>,
    %c0_151 = arith.constant 0 : index
    %c0_152 = arith.constant 0 : index
    %304 = vector.load %arg12[%c0_151, %c0_152] : memref<8x128xf32, #tpu.memory_space<vmem>>, vector<8x128xf32>
    tpu.vector_store %arg12[%c0_151, %c0_152], %302 {strides = array<i32>} : memref<8x128xf32, #tpu.memory_space<vmem>>, vector<8x128xf32>,
    %c8_i32_153 = arith.constant 8 : i32
    %305 = arith.muli %c6_i32, %c8_i32_153 : i32
    %c0_i32_154 = arith.constant 0 : i32
    %306 = arith.addi %c0_i32_154, %305 : i32
    %307 = tpu.assume_multiple %306, 8 : i32
    %308 = arith.index_cast %307 : i32 to index
    %c0_155 = arith.constant 0 : index
    %309 = vector.load %arg10[%308, %c0_155] : memref<64x128xf32, #tpu.memory_space<vmem>>, vector<8x128xf32>
    tpu.vector_store %arg10[%308, %c0_155], %302 {strides = array<i32>} : memref<64x128xf32, #tpu.memory_space<vmem>>, vector<8x128xf32>,
    %c7_i32 = arith.constant 7 : i32
    %c8_i32_156 = arith.constant 8 : i32
    %310 = arith.muli %c7_i32, %c8_i32_156 : i32
    %311 = tpu.assume_multiple %310, 8 : i32
    %312 = arith.index_cast %311 : i32 to index
    %c0_157 = arith.constant 0 : index
    %313 = vector.load %arg11[%312, %c0_157] : memref<64x512xf32, #tpu.memory_space<vmem>>, vector<8x512xf32>
    %c0_158 = arith.constant 0 : index
    %c0_159 = arith.constant 0 : index
    %314 = vector.load %arg12[%c0_158, %c0_159] : memref<8x128xf32, #tpu.memory_space<vmem>>, vector<8x128xf32>
    %c0_160 = arith.constant 0 : index
    %c0_161 = arith.constant 0 : index
    %c0_162 = arith.constant 0 : index
    %315 = vector.load %arg5[%c0_160, %c0_161, %c0_162] : memref<1x128x512xf32, #tpu.memory_space<vmem>>, vector<1x128x512xf32>
    %316 = vector.shape_cast %315 : vector<1x128x512xf32> to vector<128x512xf32>
    %cst_163 = arith.constant dense<0.000000e+00> : vector<8x512xf32>
    %317 = tpu.matmul %314, %316, %cst_163 {dimension_numbers = #tpu.dot_dimension_numbers<[1], [0], [0], [1], [0, 0, 1, 1], [], []>} : vector<8x128xf32>, vector<128x512xf32>, vector<8x512xf32> -> vector<8x512xf32>
    %318 = arith.addf %313, %317 : vector<8x512xf32>
    %319 = vector.extract_strided_slice %318 {offsets = [0, 0], sizes = [8, 128], strides = [1, 1]} : vector<8x512xf32> to vector<8x128xf32>
    %320 = arith.negf %319 : vector<8x128xf32>
    %321 = math.exp %320 : vector<8x128xf32>
    %cst_164 = arith.constant 1.000000e+00 : f32
    %322 = vector.broadcast %cst_164 : f32 to vector<8x128xf32>
    %323 = arith.addf %322, %321 : vector<8x128xf32>
    %324 = arith.divf %322, %323 : vector<8x128xf32>
    %325 = vector.extract_strided_slice %318 {offsets = [0, 128], sizes = [8, 128], strides = [1, 1]} : vector<8x512xf32> to vector<8x128xf32>
    %326 = arith.negf %325 : vector<8x128xf32>
    %327 = math.exp %326 : vector<8x128xf32>
    %cst_165 = arith.constant 1.000000e+00 : f32
    %328 = vector.broadcast %cst_165 : f32 to vector<8x128xf32>
    %329 = arith.addf %328, %327 : vector<8x128xf32>
    %330 = arith.divf %328, %329 : vector<8x128xf32>
    %331 = vector.extract_strided_slice %318 {offsets = [0, 256], sizes = [8, 128], strides = [1, 1]} : vector<8x512xf32> to vector<8x128xf32>
    %332 = math.tanh %331 : vector<8x128xf32>
    %333 = vector.extract_strided_slice %318 {offsets = [0, 384], sizes = [8, 128], strides = [1, 1]} : vector<8x512xf32> to vector<8x128xf32>
    %334 = arith.negf %333 : vector<8x128xf32>
    %335 = math.exp %334 : vector<8x128xf32>
    %cst_166 = arith.constant 1.000000e+00 : f32
    %336 = vector.broadcast %cst_166 : f32 to vector<8x128xf32>
    %337 = arith.addf %336, %335 : vector<8x128xf32>
    %338 = arith.divf %336, %337 : vector<8x128xf32>
    %c0_167 = arith.constant 0 : index
    %c0_168 = arith.constant 0 : index
    %339 = vector.load %arg13[%c0_167, %c0_168] : memref<8x128xf32, #tpu.memory_space<vmem>>, vector<8x128xf32>
    %340 = arith.mulf %330, %339 : vector<8x128xf32>
    %341 = arith.mulf %324, %332 : vector<8x128xf32>
    %342 = arith.addf %340, %341 : vector<8x128xf32>
    %343 = math.tanh %342 : vector<8x128xf32>
    %344 = arith.mulf %338, %343 : vector<8x128xf32>
    %c0_169 = arith.constant 0 : index
    %c0_170 = arith.constant 0 : index
    %345 = vector.load %arg13[%c0_169, %c0_170] : memref<8x128xf32, #tpu.memory_space<vmem>>, vector<8x128xf32>
    tpu.vector_store %arg13[%c0_169, %c0_170], %342 {strides = array<i32>} : memref<8x128xf32, #tpu.memory_space<vmem>>, vector<8x128xf32>,
    %c0_171 = arith.constant 0 : index
    %c0_172 = arith.constant 0 : index
    %346 = vector.load %arg12[%c0_171, %c0_172] : memref<8x128xf32, #tpu.memory_space<vmem>>, vector<8x128xf32>
    tpu.vector_store %arg12[%c0_171, %c0_172], %344 {strides = array<i32>} : memref<8x128xf32, #tpu.memory_space<vmem>>, vector<8x128xf32>,
    %c8_i32_173 = arith.constant 8 : i32
    %347 = arith.muli %c7_i32, %c8_i32_173 : i32
    %c0_i32_174 = arith.constant 0 : i32
    %348 = arith.addi %c0_i32_174, %347 : i32
    %349 = tpu.assume_multiple %348, 8 : i32
    %350 = arith.index_cast %349 : i32 to index
    %c0_175 = arith.constant 0 : index
    %351 = vector.load %arg10[%350, %c0_175] : memref<64x128xf32, #tpu.memory_space<vmem>>, vector<8x128xf32>
    tpu.vector_store %arg10[%350, %c0_175], %344 {strides = array<i32>} : memref<64x128xf32, #tpu.memory_space<vmem>>, vector<8x128xf32>,
    %c8_i32_176 = arith.constant 8 : i32
    %c1_i32_177 = arith.constant 1 : i32
    %352 = arith.cmpi eq, %arg0, %c1_i32_177 : i32
    %353 = arith.extui %352 : i1 to i32
    %c0_i32_178 = arith.constant 0 : i32
    %354 = arith.cmpi ne, %353, %c0_i32_178 : i32
    scf.if %354 {
      %c0_179 = arith.constant 0 : index
      %c0_180 = arith.constant 0 : index
      %355 = vector.load %arg10[%c0_179, %c0_180] : memref<64x128xf32, #tpu.memory_space<vmem>>, vector<64x128xf32>
      %c0_181 = arith.constant 0 : index
      %c0_182 = arith.constant 0 : index
      %356 = vector.load %arg7[%c0_181, %c0_182] : memref<128x128xf32, #tpu.memory_space<vmem>>, vector<128x128xf32>
      %cst_183 = arith.constant dense<0.000000e+00> : vector<64x128xf32>
      %357 = tpu.matmul %355, %356, %cst_183 {dimension_numbers = #tpu.dot_dimension_numbers<[1], [0], [0], [1], [0, 0, 1, 1], [], []>} : vector<64x128xf32>, vector<128x128xf32>, vector<64x128xf32> -> vector<64x128xf32>
      %c0_184 = arith.constant 0 : index
      %c0_185 = arith.constant 0 : index
      %358 = vector.load %arg8[%c0_184, %c0_185] : memref<1x128xf32, #tpu.memory_space<vmem>>, vector<1x128xf32>
      %359 = vector.broadcast %358 : vector<1x128xf32> to vector<64x128xf32>
      %360 = arith.addf %357, %359 : vector<64x128xf32>
      %c0_186 = arith.constant 0 : index
      %c0_187 = arith.constant 0 : index
      %361 = vector.load %arg9[%c0_186, %c0_187] : memref<64x128xf32, #tpu.memory_space<vmem>>, vector<64x128xf32>
      tpu.vector_store %arg9[%c0_186, %c0_187], %360 {strides = array<i32>} : memref<64x128xf32, #tpu.memory_space<vmem>>, vector<64x128xf32>,
    } else {
    }
    return
  }
  func.func @transform_0(%arg0: i32) -> (i32, i32) {
    %c0_i32 = arith.constant 0 : i32
    %c0_i32_0 = arith.constant 0 : i32
    %c0_i32_1 = arith.constant 0 : i32
    return %c0_i32, %c0_i32_0 : i32, i32
  }
  func.func @transform_1(%arg0: i32) -> (i32, i32) {
    %c0_i32 = arith.constant 0 : i32
    %c0_i32_0 = arith.constant 0 : i32
    %c0_i32_1 = arith.constant 0 : i32
    return %c0_i32, %c0_i32_0 : i32, i32
  }
  func.func @transform_2(%arg0: i32) -> (i32, i32) {
    %c0_i32 = arith.constant 0 : i32
    %c0_i32_0 = arith.constant 0 : i32
    %c0_i32_1 = arith.constant 0 : i32
    return %c0_i32, %c0_i32_0 : i32, i32
  }
  func.func @transform_3(%arg0: i32) -> (i32, i32, i32) {
    %c0_i32 = arith.constant 0 : i32
    %c0_i32_0 = arith.constant 0 : i32
    %c0_i32_1 = arith.constant 0 : i32
    return %arg0, %c0_i32, %c0_i32_0 : i32, i32, i32
  }
  func.func @transform_4(%arg0: i32) -> (i32, i32, i32) {
    %c0_i32 = arith.constant 0 : i32
    %c0_i32_0 = arith.constant 0 : i32
    %c0_i32_1 = arith.constant 0 : i32
    return %arg0, %c0_i32, %c0_i32_0 : i32, i32, i32
  }
  func.func @transform_5(%arg0: i32) -> (i32, i32, i32) {
    %c0_i32 = arith.constant 0 : i32
    %c0_i32_0 = arith.constant 0 : i32
    %c0_i32_1 = arith.constant 0 : i32
    return %arg0, %c0_i32, %c0_i32_0 : i32, i32, i32
  }
  func.func @transform_6(%arg0: i32) -> (i32, i32) {
    %c0_i32 = arith.constant 0 : i32
    %c0_i32_0 = arith.constant 0 : i32
    %c0_i32_1 = arith.constant 0 : i32
    return %c0_i32, %c0_i32_0 : i32, i32
  }
  func.func @transform_7(%arg0: i32) -> (i32, i32) {
    %c0_i32 = arith.constant 0 : i32
    %c0_i32_0 = arith.constant 0 : i32
    %c0_i32_1 = arith.constant 0 : i32
    return %c0_i32, %c0_i32_0 : i32, i32
  }
  func.func @transform_8(%arg0: i32) -> (i32, i32) {
    %c0_i32 = arith.constant 0 : i32
    %c0_i32_0 = arith.constant 0 : i32
    %c0_i32_1 = arith.constant 0 : i32
    return %c0_i32, %c0_i32_0 : i32, i32
  }
}

</mosaic_0001>

<bundles_post_ra>
// kernel: tpu_custom_call.1
= control target key start
LH: loop header
LB: loop body
LE: loop exit
PB: predicated region body
PF: predicated region fallthrough
CT: control target
= control target key end

     0   :  { %s5341_s0 = inlined_call_operand.vmem [shape: f32[64,8], index: 0, kind: input, shape index: {}]   ;;  %s5342_s1 = inlined_call_operand.vmem [shape: f32[8,128], index: 1, kind: input, shape index: {}]   ;;  %s5343_s2 = inlined_call_operand.vmem [shape: f32[1,128], index: 2, kind: input, shape index: {}]   ;;  %s5344_s3 = inlined_call_operand.hbm [shape: f32[2,128,512], index: 3, kind: input, shape index: {}]   ;;  %s5345_s4 = inlined_call_operand.hbm [shape: f32[2,128,512], index: 4, kind: input, shape index: {}]   ;;  %s5346_s5 = inlined_call_operand.vmem [shape: f32[2,1,512], index: 5, kind: input, shape index: {}]   ;;  %s5347_s6 = inlined_call_operand.hbm [shape: f32[128,128], index: 6, kind: input, shape index: {}]   ;;  %s5348_s7 = inlined_call_operand.vmem [shape: f32[1,128], index: 7, kind: input, shape index: {}]   ;;  %s5349_s8 = inlined_call_operand.hbm [shape: f32[64,128], index: 8, kind: output, shape index: {}]  }
   0x1   :  { %5353 = sst [smem:[#allocation17_spill]] %s5344_s3 }
   0x2   :  { %5354 = sst [smem:[#allocation18_spill]] %s5347_s6 }
   0x3   :  { %13 = vsyncpa [#allocation7], 0 }
   0x4   :  { %15 = vsyncpa [#allocation7 + $0x1], 0 }
   0x5   :  { %16 = vsyncpa [#allocation10], 0 }
   0x6   :  { %18 = vsyncpa [#allocation10 + $0x1], 0 }
   0x7   :  { %19 = vsyncpa [#allocation8], 0  ;;  %s4389_s27 = smov 0   ;;  %s4391_s28 = smov 0  }
   0x8   :  { %s4393_s29 = smov 0   ;;  %s4395_s30 = smov 0  }
   0x9 LB: > { %s4408_s9 = sadd.s32 4294967295, %s4331_s30   ;;  %p108_p0 = scmp.ne.s32.totalorder %s4323_s28, %s4319_s27  ;;  %s4331_s30 = sphi %s4395_s30, %s5369_s30   ;;  %s4327_s29 = sphi %s4393_s29, %s5368_s29   ;;  %s4323_s28 = sphi %s4391_s28, %s5367_s28   ;;  %s4319_s27 = sphi %s4389_s27, %s5366_s27  }
   0xa   : > { %p5350_p1 = scmp.eq.s32.totalorder %s4408_s9, 0  ;;  %p3137_p2 = scmp.ge.s32.totalorder %s4331_s30, 1 }
   0xb   : > { %p234_p3 = scmp.lt.s32.totalorder %s4331_s30, 3  ;;  %s4333_s12 = smov [#allocation11]  }
   0xc   : > { %p4417_p5 = por %p5350_p1, %p108_p0  ;;  %s255_s13 = sshll.u32 %s4333_s12, 4  ;;  %s256_s13 = int_to_ptr.vmem [resolvable:$true] %s255_s13 }
   0xd   : > { %p4421_p6 = pnand %p3137_p2, %p234_p3  ;;  %s4434_s15 = sadd.s32 1, %s4331_s30  }
   0xe   : > { %s5355_s10 = scalar_select %p4417_p5, 1, 0 }
   0xf   : > { %s5356_s11 = scalar_select %p4421_p6, 1, 0 }
  0x10   : > { %p3986_p7 = pneg %p4421_p6  ;;  %s95_s16 = sadd.s32 1, %s4327_s29 }
  0x11   : > { %s92_s17 = ssub.s32 %s4331_s30, %s4434_s15  ;;  %s5358_s6 = sld [smem:[#allocation18_spill]] }
  0x12   : > { %p4429_p8 = pnand %p3986_p7, %p5350_p1 }
  0x14   : > { %p4173_p10 = pneg %p4429_p8 }
  0x17   : > { %s4171_s20 = scalar_lea.hbm %s5358_s6, 2048 }
  0x18   : > { %p4172_p9 = scmp.ne.s32.totalorder %s5358_s6, %s4171_s20  ;;  %p4178_p13 = scmp.lt.u32.totalorder %s4171_s20, %s5358_s6 }
  0x1a   : > { %p4174_p11 = pnand %p4173_p10, %p4172_p9 }
  0x1c   : > { %p4175_p12 = pneg %p4174_p11 }
  0x1e   : > { %p4180_p0 = pnand %p4178_p13, %p4175_p12 }
  0x20   : > { %4183 = shalt.err (!%p4180_p0)
}
  0x21   : > { %s4184_s25 = scalar_lea.vmem %s256_s13, 2048  ;;  %p4192_p4 = scmp.lt.s32.totalorder %s256_s13, %s256_s13 }
  0x22   : > { %p4185_p2 = scmp.ne.s32.totalorder %s256_s13, %s4184_s25  ;;  %p4193_p1 = scmp.lt.s32.totalorder %s4184_s25, %s4184_s25 }
  0x24   : > { %p4187_p3 = pnand %p4185_p2, %p4173_p10  ;;  %p4194_p5 = por %p4193_p1, %p4192_p4 }
  0x26   : > { %p4188_p7 = pneg %p4187_p3 }
  0x28   : > { %p4195_p6 = pnand %p4194_p5, %p4188_p7 }
  0x2a   : > { %4198 = shalt.err (!%p4195_p6)
}
  0x2b   : > { %s4334_s26 = smov 128   ;;  %s4335_s27 = smov 8  }
  0x2c   : > { %3989 = dma.hbm_to_vmem [thread:$0]  (!%p4429_p8), %s5358_s6, 2048, %s256_s13, [#allocation10], %s4334_s26, %s4334_s26, %s4335_s27  }
  0x2d   : > { %p93_p9 = scmp.eq.s32.totalorder %s92_s17, 0  ;;  %p102_p1 = scmp.ne.s32.totalorder %s4327_s29, %s4323_s28 }
  0x2e   : > { %p103_p4 = scmp.eq.s32.totalorder %s4331_s30, 0  ;;  %p3998_p5 = scmp.lt.s32.totalorder %s4331_s30, 2 }
  0x2f   : > { %s4460_s19 = scalar_select %p93_p9, %s4327_s29, %s95_s16  }
  0x30   : > { %p104_p6 = por %p103_p4, %p102_p1  ;;  %s272_s20 = sand.u32 1, %s4327_s29  }
  0x31   : > { %s4463_s21 = sshll.u32 %s272_s20, 9  ;;  %s3191_s22 = sshll.u32 %s4331_s30, 13 }
  0x32   : > { %s5359_s3 = sld [smem:[#allocation17_spill]]  ;;  %s276_s13 = scalar_lea.vmem [#allocation6], %s4463_s21 }
  0x33   : > { %s283_s17 = sshll.u32 %s276_s13, 4  ;;  %p4476_p8 = pnand %p3998_p5, %p104_p6  ;;  %s4474_s17 = int_to_ptr.vmem [resolvable:$true] %s283_s17 }
  0x34   : > { %s4480_s25 = scalar_lea.sflag [#allocation7], %s272_s20 }
  0x35   : > { %p4201_p11 = pneg %p4476_p8 }
  0x38   : > { %s4471_s14 = scalar_lea.hbm %s5359_s3, %s3191_s22  ;;  %s4204_s18 = scalar_lea.hbm %s5359_s3, 16384 }
  0x39   : > { %s4199_s26 = scalar_lea.hbm %s4471_s14, 8192  ;;  %p4205_p0 = scmp.lt.u32.totalorder %s4471_s14, %s5359_s3 }
  0x3a   : > { %p4200_p10 = scmp.ne.s32.totalorder %s4471_s14, %s4199_s26  ;;  %p4206_p2 = scmp.lt.u32.totalorder %s4204_s18, %s4199_s26 }
  0x3b   : > { %p4208_p7 = scmp.lt.u32.totalorder %s4199_s26, %s4471_s14 }
  0x3c   : > { %p4202_p12 = pnand %p4201_p11, %p4200_p10  ;;  %p4207_p3 = por %p4206_p2, %p4205_p0 }
  0x3e   : > { %p4203_p13 = pneg %p4202_p12  ;;  %p4209_p9 = por %p4208_p7, %p4207_p3 }
  0x40   : > { %p4210_p1 = pnand %p4209_p9, %p4203_p13 }
  0x42   : > { %4213 = shalt.err (!%p4210_p1)
}
  0x43   : > { %s4214_s20 = scalar_lea.vmem %s4474_s17, 8192  ;;  %s4336_s13 = smov [#allocation6]  }
  0x44   : > { %p4215_p4 = scmp.ne.s32.totalorder %s4474_s17, %s4214_s20  ;;  %s4219_s27 = sshll.u32 %s4336_s13, 4  ;;  %s4220_s27 = int_to_ptr.vmem [resolvable:$false] %s4219_s27 }
  0x45   : > { %s4221_s12 = scalar_lea.vmem %s4220_s27, 16384  ;;  %p4222_p10 = scmp.lt.s32.totalorder %s4474_s17, %s4220_s27 }
  0x46   : > { %p4217_p5 = pnand %p4215_p4, %p4201_p11  ;;  %p4223_p12 = scmp.lt.s32.totalorder %s4221_s12, %s4214_s20 }
  0x48   : > { %p4218_p6 = pneg %p4217_p5  ;;  %p4224_p0 = por %p4223_p12, %p4222_p10 }
  0x4a   : > { %p4225_p2 = pnand %p4224_p0, %p4218_p6 }
  0x4c   : > { %4228 = shalt.err (!%p4225_p2)
}
  0x4d   : > { %s4337_s26 = smov 512   ;;  %s4338_s18 = smov 32  }
  0x4e   : > { %3993 = dma.hbm_to_vmem [thread:$0]  (!%p4476_p8), %s4471_s14, 8192, %s4474_s17, %s4480_s25, %s4337_s26, %s4337_s26, %s4338_s18  }
  0x4f   : > { %s4516_s20 = scalar_lea.hbm %s5345_s4, %s3191_s22  ;;  %s297_s13 = scalar_lea.vmem [#allocation9], %s4463_s21 }
  0x50   : > { %s304_s27 = sshll.u32 %s297_s13, 4  ;;  %s293_s12 = sand.u32 1, %s4331_s30   ;;  %s4519_s27 = int_to_ptr.vmem [resolvable:$true] %s304_s27 }
  0x51   : > { %s4522_s3 = scalar_lea.sflag [#allocation10], %s293_s12  ;;  %s4229_s6 = scalar_lea.hbm %s4516_s20, 8192 }
  0x52   : > { %p4230_p13 = scmp.ne.s32.totalorder %s4516_s20, %s4229_s6  ;;  %s4234_s17 = scalar_lea.hbm %s5345_s4, 16384 }
  0x53   : > { %p4235_p9 = scmp.lt.u32.totalorder %s4516_s20, %s5345_s4  ;;  %p4236_p1 = scmp.lt.u32.totalorder %s4234_s17, %s4229_s6 }
  0x54   : > { %p4232_p3 = pnand %p4230_p13, %p4201_p11  ;;  %p4238_p5 = scmp.lt.u32.totalorder %s4229_s6, %s4516_s20 }
  0x55   : > { %p4237_p4 = por %p4236_p1, %p4235_p9 }
  0x56   : > { %p4233_p7 = pneg %p4232_p3 }
  0x57   : > { %p4239_p6 = por %p4238_p5, %p4237_p4 }
  0x59   : > { %p4240_p10 = pnand %p4239_p6, %p4233_p7 }
  0x5b   : > { %4243 = shalt.err (!%p4240_p10)
}
  0x5c   : > { %s4244_s30 = scalar_lea.vmem %s4519_s27, 8192  ;;  %s4339_s21 = smov [#allocation9]  }
  0x5d   : > { %p4245_p12 = scmp.ne.s32.totalorder %s4519_s27, %s4244_s30  ;;  %s4249_s24 = sshll.u32 %s4339_s21, 4  ;;  %s4250_s24 = int_to_ptr.vmem [resolvable:$false] %s4249_s24 }
  0x5e   : > { %s4251_s13 = scalar_lea.vmem %s4250_s24, 16384  ;;  %p4252_p13 = scmp.lt.s32.totalorder %s4519_s27, %s4250_s24 }
  0x5f   : > { %p4247_p0 = pnand %p4245_p12, %p4201_p11  ;;  %p4253_p3 = scmp.lt.s32.totalorder %s4251_s13, %s4244_s30 }
  0x61   : > { %p4248_p2 = pneg %p4247_p0  ;;  %p4254_p9 = por %p4253_p3, %p4252_p13 }
  0x63   : > { %p4255_p1 = pnand %p4254_p9, %p4248_p2 }
  0x65   : > { %4258 = shalt.err (!%p4255_p1)
}
  0x66   : > { %3996 = dma.hbm_to_vmem [thread:$0]  (!%p4476_p8), %s4516_s20, 8192, %s4519_s27, %s4522_s3, %s4337_s26, %s4337_s26, %s4338_s18  }
  0x67   : > { %p5361_p11 = scmp.ne.s32.totalorder %s5356_s11, 0 }
  0x68   : > { %s325_s6 = sand.u32 (!%p5361_p11), 1, %s4323_s28   ;;  %p5362_p7 = scmp.ne.s32.totalorder (!%p5361_p11), %s5355_s10, 0 }
  0x69   : > { %323 = sbr.rel (%p5361_p11) target bundleno = 2729 (0xaa9), region = 52  ;;  %s3147_s12 = sshll.u32 (!%p5361_p11), %s325_s6, 9 }
  0x6a   : > { %s326_s14 = scalar_lea.sflag (!%p5361_p11), [#allocation7], %s325_s6  ;;  %s4554_s22 = scalar_lea.vmem (!%p5361_p11), [#allocation6], %s3147_s12 }
  0x70   : > { %4302 = dma.done.wait (%p5362_p7), %s326_s14, 8192  }
  0x71   : > { %4304 = vsyncadd (%p5362_p7), %s326_s14, 4294959104  ;;  %s334_s16 = sand.u32 1, %s4408_s9   ;;  %s4561_s3 = scalar_lea.vmem [#allocation9], %s3147_s12 }
  0x72   : > { %s335_s17 = scalar_lea.sflag [#allocation10], %s334_s16 }
  0x73   : > { %4306 = dma.done.wait (%p5362_p7), %s335_s17, 8192  }
  0x74   : > { %4308 = vsyncadd (%p5362_p7), %s335_s17, 4294959104  ;;  %p5363_p8 = scmp.eq.s32.totalorder %s4408_s9, 0 }
  0x76   : > { %4310 = dma.done.wait (%p5363_p8), [#allocation10], 2048   ;;  %p5364_p4 = pmov %p5363_p8 }
  0x77   : > { %p379_p5 = scmp.lt.s32.totalorder %s4408_s9, 1  ;;  %p5365_p6 = scmp.ne.s32.totalorder %s4408_s9, 0 }
  0x78   : > { %4312 = vsyncadd (%p5364_p4), [#allocation10], 4294965248  ;;  %v395_v0 = vld [vmem:[%s5342_s1] sm:$0xff] (!%p5365_p6)  ;;  %vm403_vm0 = vcmask (!%p5365_p6), 64512   ;;  %v388_v3 = vld [vmem:[%s5341_s0 + $0x8] sm:$0xff] (!%p5365_p6) }
  0x79   : > { %s380_s11 = scalar_select %p379_p5, %s4408_s9, 1 }
  0x7a   : > { %386 = sbr.rel (%p5365_p6) target bundleno = 347 (0x15b), region = 68  ;;  %v387_v1 = vld [vmem:[%s5341_s0] sm:$0xff] (!%p5365_p6)  ;;  %3226 = vmatprep.subr.mxu0 (!%p5365_p6), %v395_v0  ;;  %3892 = vmatprep.subr.mxu1 (!%p5365_p6), %v395_v0  ;;  %v392_v4 = vld [vmem:[%s5341_s0 + $0x28] sm:$0xff] (!%p5365_p6)  ;;  %v389_v5 = vld [vmem:[%s5341_s0 + $0x10] sm:$0xff] (!%p5365_p6) }
  0x7b   : > { %s3150_s26 = sshll.u32 %s380_s11, 2  ;;  %v391_v2 = vld [vmem:[%s5341_s0 + $0x20] sm:$0xff] (!%p5365_p6)  ;;  %3227 = vmatpush3.msra.mxu0 (!%p5365_p6), %v395_v0  ;;  %3893 = vmatpush3.msra.mxu1 (!%p5365_p6), %v395_v0  ;;  %v393_v6 = vld [vmem:[%s5341_s0 + $0x30] sm:$0xff] (!%p5365_p6)  ;;  %v390_v7 = vld [vmem:[%s5341_s0 + $0x18] sm:$0xff] (!%p5365_p6) }
  0x7c   : > { %s4576_s27 = scalar_lea.vmem %s5346_s5, %s3150_s26  ;;  %3228 = vmatprep.mubr.msk.f32.mxu0 (!%p5365_p6), %vm403_vm0, %v387_v1  ;;  %3234 = vmatprep.mubr.msk.f32.mxu1 (!%p5365_p6), %vm403_vm0, %v391_v2  ;;  %v394_v8 = vld [vmem:[%s5341_s0 + $0x38] sm:$0xff] (!%p5365_p6)  ;;  %v3152_v9 = vld [vmem:[%s5343_s2] ss:$0 sm:$0xff] (!%p5365_p6) }
  0x7d   : > { %3229 = vmatmul.mubr.msk.f32.vlgmr.msra.gmra.mrb[0].mxu0 (!%p5365_p6), %vm403_vm0, %v388_v3  ;;  %3235 = vmatmul.mubr.msk.f32.vlgmr.msra.gmra.mrb[0].mxu1 (!%p5365_p6), %vm403_vm0, %v392_v4 }
  0x7e   : > { %3231 = vmatprep.mubr.msk.f32.mxu0 (!%p5365_p6), %vm403_vm0, %v389_v5  ;;  %3237 = vmatprep.mubr.msk.f32.mxu1 (!%p5365_p6), %vm403_vm0, %v393_v6 }
  0x81   : > { %3232 = vmatmul.mubr.msk.f32.gmra.mrb[2].mxu0 %vm403_vm0, %v390_v7  ;;  %3238 = vmatmul.mubr.msk.f32.gmra.mrb[2].mxu1 %vm403_vm0, %v394_v8 }
 0x150   : > { %v3230_v10 = vpop.f32.mrb[0].mxu0  ;;  %v3236_v11 = vpop.f32.mrb[0].mxu1 }
 0x151   : > { %v500_v12 = vadd.f32 %v3230_v10, %v3152_v9  ;;  %v520_v13 = vadd.f32 %v3236_v11, %v3152_v9  ;;  %v494_v14 = vpop.f32.mrb[1].mxu0  ;;  %v514_v15 = vpop.f32.mrb[1].mxu1 }
 0x152   : > { %v495_v16 = vadd.f32 %v3152_v9, %v494_v14  ;;  %v515_v17 = vadd.f32 %v3152_v9, %v514_v15 }
 0x153   : > { %v534_v18 = vmax.f32 %v500_v12, 0.0  ;;  %v538_v19 = vmax.f32 %v520_v13, 0.0 }
 0x154   : > { %v533_v20 = vmax.f32 %v495_v16, 0.0  ;;  %v537_v21 = vmax.f32 %v515_v17, 0.0  ;;  %v3233_v22 = vpop.f32.mrb[2].mxu0  ;;  %v3239_v23 = vpop.f32.mrb[2].mxu1 }
 0x155   : > { %542 = vst [vmem:[#allocation2 + $0x8] sm:$0xff] %v534_v18  ;;  %546 = vst [vmem:[#allocation2 + $0x28] sm:$0xff] %v538_v19  ;;  %v510_v24 = vadd.f32 %v3233_v22, %v3152_v9  ;;  %v530_v25 = vadd.f32 %v3239_v23, %v3152_v9  ;;  %v504_v26 = vpop.f32.mrb[3].mxu0  ;;  %v524_v27 = vpop.f32.mrb[3].mxu1 }
 0x156   : > { %541 = vst [vmem:[#allocation2] sm:$0xff] %v533_v20  ;;  %545 = vst [vmem:[#allocation2 + $0x20] sm:$0xff] %v537_v21  ;;  %v505_v28 = vadd.f32 %v3152_v9, %v504_v26  ;;  %v525_v29 = vadd.f32 %v3152_v9, %v524_v27 }
 0x157   : > { %v536_v30 = vmax.f32 %v510_v24, 0.0  ;;  %v540_v31 = vmax.f32 %v530_v25, 0.0 }
 0x158   : > { %v535_v32 = vmax.f32 %v505_v28, 0.0  ;;  %v539_v33 = vmax.f32 %v525_v29, 0.0 }
 0x159   : > { %544 = vst [vmem:[#allocation2 + $0x18] sm:$0xff] %v536_v30  ;;  %548 = vst [vmem:[#allocation2 + $0x38] sm:$0xff] %v540_v31 }
 0x15a   : > { %543 = vst [vmem:[#allocation2 + $0x10] sm:$0xff] %v535_v32  ;;  %547 = vst [vmem:[#allocation2 + $0x30] sm:$0xff] %v539_v33 }
 0x15b PF: > { %v560_v34 = vld [vmem:[%s4554_s22 + $0x8] sm:$0xff]  ;;  %v562_v36 = vld [vmem:[%s4554_s22 + $0x18] sm:$0xff]  ;;  %v559_v39 = vld [vmem:[%s4554_s22] sm:$0xff]  ;;  %v4340_v41 = vmov 0.0   ;;  %p3185_p10 = scmp.ne.s32.totalorder %s4408_s9, 1 }
 0x15c   : > { %v564_v35 = vld [vmem:[%s4554_s22 + $0x28] sm:$0xff]  ;;  %v566_v38 = vld [vmem:[%s4554_s22 + $0x38] sm:$0xff]  ;;  %v563_v40 = vld [vmem:[%s4554_s22 + $0x20] sm:$0xff]  ;;  %709 = vmatprep.mubr.f32.mxu0 %v4340_v41  ;;  %822 = vmatprep.mubr.f32.mxu1 %v4340_v41 }
 0x15d   : > { %v3284_v37 = vpack.c.bf16 %v564_v35, %v560_v34  ;;  %v3316_v42 = vpack.c.bf16 %v566_v38, %v562_v36  ;;  %v3286_v43 = vpack.c.bf16 %v563_v40, %v559_v39  ;;  %v561_v44 = vld [vmem:[%s4554_s22 + $0x10] sm:$0xff]  ;;  %v568_v46 = vld [vmem:[%s4554_s22 + $0x48] sm:$0xff]  ;;  %v570_v49 = vld [vmem:[%s4554_s22 + $0x58] sm:$0xff] }
 0x15e   : > { %v565_v45 = vld [vmem:[%s4554_s22 + $0x30] sm:$0xff]  ;;  %v572_v48 = vld [vmem:[%s4554_s22 + $0x68] sm:$0xff]  ;;  %v574_v50 = vld [vmem:[%s4554_s22 + $0x78] sm:$0xff] }
 0x15f   : > { %3285 = vmatprep.subr.bf16.mxu0 %v3284_v37  ;;  %v3318_v47 = vpack.c.bf16 %v565_v45, %v561_v44  ;;  %3317 = vmatprep.subr.bf16.mxu1 %v3316_v42  ;;  %v3288_v51 = vpack.c.bf16 %v572_v48, %v568_v46  ;;  %v3320_v52 = vpack.c.bf16 %v574_v50, %v570_v49  ;;  %v567_v53 = vld [vmem:[%s4554_s22 + $0x40] sm:$0xff]  ;;  %v569_v55 = vld [vmem:[%s4554_s22 + $0x50] sm:$0xff]  ;;  %v576_v58 = vld [vmem:[%s4554_s22 + $0x88] sm:$0xff] }
 0x160   : > { %3287 = vmatpush1.bf16.msra.mxu0 %v3286_v43  ;;  %v571_v54 = vld [vmem:[%s4554_s22 + $0x60] sm:$0xff]  ;;  %v573_v57 = vld [vmem:[%s4554_s22 + $0x70] sm:$0xff]  ;;  %v580_v59 = vld [vmem:[%s4554_s22 + $0xa8] sm:$0xff] }
 0x161   : > { %3319 = vmatpush1.bf16.msra.mxu1 %v3318_v47  ;;  %v3290_v56 = vpack.c.bf16 %v571_v54, %v567_v53  ;;  %3289 = vmatprep.subr.bf16.mxu0 %v3288_v51  ;;  %v3322_v60 = vpack.c.bf16 %v573_v57, %v569_v55  ;;  %v3292_v61 = vpack.c.bf16 %v580_v59, %v576_v58  ;;  %v578_v62 = vld [vmem:[%s4554_s22 + $0x98] sm:$0xff]  ;;  %v575_v0 = vld [vmem:[%s4554_s22 + $0x80] sm:$0xff]  ;;  %v577_v3 = vld [vmem:[%s4554_s22 + $0x90] sm:$0xff] }
 0x162   : > { %3321 = vmatprep.subr.bf16.mxu1 %v3320_v52  ;;  %v582_v63 = vld [vmem:[%s4554_s22 + $0xb8] sm:$0xff]  ;;  %v579_v2 = vld [vmem:[%s4554_s22 + $0xa0] sm:$0xff]  ;;  %v581_v4 = vld [vmem:[%s4554_s22 + $0xb0] sm:$0xff] }
 0x163   : > { %v3324_v1 = vpack.c.bf16 %v582_v63, %v578_v62  ;;  %v3294_v5 = vpack.c.bf16 %v579_v2, %v575_v0  ;;  %v584_v6 = vld [vmem:[%s4554_s22 + $0xc8] sm:$0xff]  ;;  %v586_v8 = vld [vmem:[%s4554_s22 + $0xd8] sm:$0xff]  ;;  %v3326_v9 = vpack.c.bf16 %v581_v4, %v577_v3  ;;  %v583_v12 = vld [vmem:[%s4554_s22 + $0xc0] sm:$0xff] }
 0x164   : > { %3291 = vmatpush1.bf16.msra.mxu0 %v3290_v56  ;;  %v588_v7 = vld [vmem:[%s4554_s22 + $0xe8] sm:$0xff]  ;;  %v590_v11 = vld [vmem:[%s4554_s22 + $0xf8] sm:$0xff]  ;;  %v587_v13 = vld [vmem:[%s4554_s22 + $0xe0] sm:$0xff] }
 0x165   : > { %3323 = vmatpush1.bf16.msra.mxu1 %v3322_v60  ;;  %3293 = vmatprep.subr.bf16.mxu0 %v3292_v61  ;;  %v3296_v10 = vpack.c.bf16 %v588_v7, %v584_v6  ;;  %v3328_v14 = vpack.c.bf16 %v590_v11, %v586_v8  ;;  %v585_v15 = vld [vmem:[%s4554_s22 + $0xd0] sm:$0xff]  ;;  %v592_v17 = vld [vmem:[%s4554_s22 + $0x108] sm:$0xff]  ;;  %v594_v19 = vld [vmem:[%s4554_s22 + $0x118] sm:$0xff]  ;;  %v3298_v21 = vpack.c.bf16 %v587_v13, %v583_v12 }
 0x166   : > { %3325 = vmatprep.subr.bf16.mxu1 %v3324_v1  ;;  %v589_v16 = vld [vmem:[%s4554_s22 + $0xf0] sm:$0xff]  ;;  %v596_v18 = vld [vmem:[%s4554_s22 + $0x128] sm:$0xff]  ;;  %v598_v20 = vld [vmem:[%s4554_s22 + $0x138] sm:$0xff] }
 0x167   : > { %v3330_v22 = vpack.c.bf16 %v589_v16, %v585_v15  ;;  %v3300_v23 = vpack.c.bf16 %v596_v18, %v592_v17  ;;  %v591_v24 = vld [vmem:[%s4554_s22 + $0x100] sm:$0xff]  ;;  %v593_v26 = vld [vmem:[%s4554_s22 + $0x110] sm:$0xff]  ;;  %v3332_v27 = vpack.c.bf16 %v598_v20, %v594_v19  ;;  %v600_v29 = vld [vmem:[%s4554_s22 + $0x148] sm:$0xff] }
 0x168   : > { %3295 = vmatpush1.bf16.msra.mxu0 %v3294_v5  ;;  %v595_v25 = vld [vmem:[%s4554_s22 + $0x120] sm:$0xff]  ;;  %v597_v28 = vld [vmem:[%s4554_s22 + $0x130] sm:$0xff]  ;;  %v604_v30 = vld [vmem:[%s4554_s22 + $0x168] sm:$0xff] }
 0x169   : > { %3327 = vmatpush1.bf16.msra.mxu1 %v3326_v9  ;;  %3297 = vmatprep.subr.bf16.mxu0 %v3296_v10  ;;  %v602_v31 = vld [vmem:[%s4554_s22 + $0x158] sm:$0xff]  ;;  %v3302_v33 = vpack.c.bf16 %v595_v25, %v591_v24  ;;  %v3334_v34 = vpack.c.bf16 %v597_v28, %v593_v26  ;;  %v3304_v35 = vpack.c.bf16 %v604_v30, %v600_v29  ;;  %v599_v36 = vld [vmem:[%s4554_s22 + $0x140] sm:$0xff]  ;;  %v601_v38 = vld [vmem:[%s4554_s22 + $0x150] sm:$0xff] }
 0x16a   : > { %3329 = vmatprep.subr.bf16.mxu1 %v3328_v14  ;;  %v606_v32 = vld [vmem:[%s4554_s22 + $0x178] sm:$0xff]  ;;  %v603_v37 = vld [vmem:[%s4554_s22 + $0x160] sm:$0xff]  ;;  %v605_v40 = vld [vmem:[%s4554_s22 + $0x170] sm:$0xff] }
 0x16b   : > { %v3336_v39 = vpack.c.bf16 %v606_v32, %v602_v31  ;;  %v608_v42 = vld [vmem:[%s4554_s22 + $0x188] sm:$0xff]  ;;  %v610_v44 = vld [vmem:[%s4554_s22 + $0x198] sm:$0xff]  ;;  %v3306_v46 = vpack.c.bf16 %v603_v37, %v599_v36  ;;  %v3338_v47 = vpack.c.bf16 %v605_v40, %v601_v38  ;;  %v607_v49 = vld [vmem:[%s4554_s22 + $0x180] sm:$0xff] }
 0x16c   : > { %3299 = vmatpush1.bf16.msra.mxu0 %v3298_v21  ;;  %v612_v43 = vld [vmem:[%s4554_s22 + $0x1a8] sm:$0xff]  ;;  %v614_v45 = vld [vmem:[%s4554_s22 + $0x1b8] sm:$0xff]  ;;  %v611_v50 = vld [vmem:[%s4554_s22 + $0x1a0] sm:$0xff] }
 0x16d   : > { %3331 = vmatpush1.bf16.msra.mxu1 %v3330_v22  ;;  %3301 = vmatprep.subr.bf16.mxu0 %v3300_v23  ;;  %v3308_v48 = vpack.c.bf16 %v612_v43, %v608_v42  ;;  %v609_v51 = vld [vmem:[%s4554_s22 + $0x190] sm:$0xff]  ;;  %v3340_v52 = vpack.c.bf16 %v614_v45, %v610_v44  ;;  %v616_v54 = vld [vmem:[%s4554_s22 + $0x1c8] sm:$0xff]  ;;  %v618_v56 = vld [vmem:[%s4554_s22 + $0x1d8] sm:$0xff]  ;;  %v3310_v58 = vpack.c.bf16 %v611_v50, %v607_v49 }
 0x16e   : > { %3333 = vmatprep.subr.bf16.mxu1 %v3332_v27  ;;  %v613_v53 = vld [vmem:[%s4554_s22 + $0x1b0] sm:$0xff]  ;;  %v620_v55 = vld [vmem:[%s4554_s22 + $0x1e8] sm:$0xff]  ;;  %v622_v57 = vld [vmem:[%s4554_s22 + $0x1f8] sm:$0xff] }
 0x16f   : > { %v3342_v59 = vpack.c.bf16 %v613_v53, %v609_v51  ;;  %v3312_v60 = vpack.c.bf16 %v620_v55, %v616_v54  ;;  %v615_v61 = vld [vmem:[%s4554_s22 + $0x1c0] sm:$0xff]  ;;  %v617_v63 = vld [vmem:[%s4554_s22 + $0x1d0] sm:$0xff]  ;;  %v3344_v0 = vpack.c.bf16 %v622_v57, %v618_v56  ;;  %v912_v2 = vld [vmem:[%s4561_s3 + $0x8] sm:$0xff] }
 0x170   : > { %3303 = vmatpush1.bf16.msra.mxu0 %v3302_v33  ;;  %v619_v62 = vld [vmem:[%s4554_s22 + $0x1e0] sm:$0xff]  ;;  %v621_v1 = vld [vmem:[%s4554_s22 + $0x1f0] sm:$0xff]  ;;  %v916_v3 = vld [vmem:[%s4561_s3 + $0x28] sm:$0xff] }
 0x171   : > { %3335 = vmatpush1.bf16.msra.mxu1 %v3334_v34  ;;  %3305 = vmatprep.subr.bf16.mxu0 %v3304_v35  ;;  %v914_v4 = vld [vmem:[%s4561_s3 + $0x18] sm:$0xff]  ;;  %v3314_v6 = vpack.c.bf16 %v619_v62, %v615_v61  ;;  %v3346_v7 = vpack.c.bf16 %v621_v1, %v617_v63  ;;  %v4688_v8 = vpack.c.bf16 %v916_v3, %v912_v2  ;;  %v911_v9 = vld [vmem:[%s4561_s3] sm:$0xff]  ;;  %v913_v12 = vld [vmem:[%s4561_s3 + $0x10] sm:$0xff] }
 0x172   : > { %3337 = vmatprep.subr.bf16.mxu1 %v3336_v39  ;;  %v918_v5 = vld [vmem:[%s4561_s3 + $0x38] sm:$0xff]  ;;  %v915_v10 = vld [vmem:[%s4561_s3 + $0x20] sm:$0xff]  ;;  %v917_v13 = vld [vmem:[%s4561_s3 + $0x30] sm:$0xff] }
 0x173   : > { %v4692_v11 = vpack.c.bf16 %v918_v5, %v914_v4  ;;  %v920_v14 = vld [vmem:[%s4561_s3 + $0x48] sm:$0xff]  ;;  %v551_v16 = vld [vmem:[#allocation2] sm:$0xff]  ;;  %v4698_v17 = vpack.c.bf16 %v915_v10, %v911_v9  ;;  %v922_v18 = vld [vmem:[%s4561_s3 + $0x58] sm:$0xff]  ;;  %v4703_v20 = vpack.c.bf16 %v917_v13, %v913_v12 }
 0x174   : > { %3307 = vmatpush1.bf16.msra.mxu0 %v3306_v46  ;;  %v924_v15 = vld [vmem:[%s4561_s3 + $0x68] sm:$0xff]  ;;  %v926_v19 = vld [vmem:[%s4561_s3 + $0x78] sm:$0xff]  ;;  %v919_v21 = vld [vmem:[%s4561_s3 + $0x40] sm:$0xff] }
 0x175   : > { %3339 = vmatpush1.bf16.msra.mxu1 %v3338_v47  ;;  %3309 = vmatprep.subr.bf16.mxu0 %v3308_v48  ;;  %v923_v22 = vld [vmem:[%s4561_s3 + $0x60] sm:$0xff]  ;;  %v4708_v23 = vpack.c.bf16 %v924_v15, %v920_v14  ;;  %v921_v24 = vld [vmem:[%s4561_s3 + $0x50] sm:$0xff]  ;;  %v4712_v26 = vpack.c.bf16 %v926_v19, %v922_v18  ;;  %v928_v27 = vld [vmem:[%s4561_s3 + $0x88] sm:$0xff] }
 0x176   : > { %3341 = vmatprep.subr.bf16.mxu1 %v3340_v52  ;;  %v925_v25 = vld [vmem:[%s4561_s3 + $0x70] sm:$0xff]  ;;  %v932_v28 = vld [vmem:[%s4561_s3 + $0xa8] sm:$0xff]  ;;  %v4717_v30 = vpack.c.bf16 %v923_v22, %v919_v21  ;;  %v930_v31 = vld [vmem:[%s4561_s3 + $0x98] sm:$0xff] }
 0x177   : > { %v552_v29 = vld [vmem:[#allocation2 + $0x8] sm:$0xff]  ;;  %v934_v32 = vld [vmem:[%s4561_s3 + $0xb8] sm:$0xff]  ;;  %v4723_v33 = vpack.c.bf16 %v925_v25, %v921_v24  ;;  %v927_v34 = vld [vmem:[%s4561_s3 + $0x80] sm:$0xff]  ;;  %v4729_v36 = vpack.c.bf16 %v932_v28, %v928_v27 }
 0x178   : > { %3311 = vmatpush1.bf16.msra.mxu0 %v3310_v58  ;;  %v931_v35 = vld [vmem:[%s4561_s3 + $0xa0] sm:$0xff]  ;;  %v929_v37 = vld [vmem:[%s4561_s3 + $0x90] sm:$0xff]  ;;  %v4734_v39 = vpack.c.bf16 %v934_v32, %v930_v31  ;;  %v936_v40 = vld [vmem:[%s4561_s3 + $0xc8] sm:$0xff] }
 0x179   : > { %3343 = vmatpush1.bf16.msra.mxu1 %v3342_v59  ;;  %3313 = vmatprep.subr.bf16.mxu0 %v3312_v60  ;;  %v933_v38 = vld [vmem:[%s4561_s3 + $0xb0] sm:$0xff]  ;;  %v940_v42 = vld [vmem:[%s4561_s3 + $0xe8] sm:$0xff]  ;;  %v4739_v44 = vpack.c.bf16 %v931_v35, %v927_v34  ;;  %v938_v45 = vld [vmem:[%s4561_s3 + $0xd8] sm:$0xff] }
 0x17a   : > { %3345 = vmatprep.subr.bf16.mxu1 %v3344_v0  ;;  %v553_v43 = vld [vmem:[#allocation2 + $0x10] sm:$0xff]  ;;  %v942_v46 = vld [vmem:[%s4561_s3 + $0xf8] sm:$0xff]  ;;  %v4745_v47 = vpack.c.bf16 %v933_v38, %v929_v37  ;;  %v935_v48 = vld [vmem:[%s4561_s3 + $0xc0] sm:$0xff]  ;;  %v4751_v50 = vpack.c.bf16 %v940_v42, %v936_v40 }
 0x17b   : > { %v939_v49 = vld [vmem:[%s4561_s3 + $0xe0] sm:$0xff]  ;;  %v937_v51 = vld [vmem:[%s4561_s3 + $0xd0] sm:$0xff]  ;;  %v4756_v53 = vpack.c.bf16 %v942_v46, %v938_v45  ;;  %v944_v54 = vld [vmem:[%s4561_s3 + $0x108] sm:$0xff] }
 0x17c   : > { %3315 = vmatpush1.bf16.msra.mxu0 %v3314_v6  ;;  %v941_v52 = vld [vmem:[%s4561_s3 + $0xf0] sm:$0xff]  ;;  %v948_v55 = vld [vmem:[%s4561_s3 + $0x128] sm:$0xff]  ;;  %v554_v56 = vld [vmem:[#allocation2 + $0x18] sm:$0xff]  ;;  %v4761_v57 = vpack.c.bf16 %v939_v49, %v935_v48 }
 0x17d   : > { %3347 = vmatpush1.bf16.msra.mxu1 %v3346_v7  ;;  %3349 = vmatprep.subr.bf16.mxu0 %v4688_v8  ;;  %v946_v58 = vld [vmem:[%s4561_s3 + $0x118] sm:$0xff]  ;;  %v4767_v60 = vpack.c.bf16 %v941_v52, %v937_v51  ;;  %v943_v61 = vld [vmem:[%s4561_s3 + $0x100] sm:$0xff]  ;;  %v4773_v63 = vpack.c.bf16 %v948_v55, %v944_v54  ;;  %v945_v0 = vld [vmem:[%s4561_s3 + $0x110] sm:$0xff] }
 0x17e   : > { %3381 = vmatprep.subr.bf16.mxu1 %v4692_v11  ;;  %v950_v59 = vld [vmem:[%s4561_s3 + $0x138] sm:$0xff]  ;;  %v947_v62 = vld [vmem:[%s4561_s3 + $0x120] sm:$0xff]  ;;  %v949_v1 = vld [vmem:[%s4561_s3 + $0x130] sm:$0xff] }
 0x17f   : > { %710 = vmatmul.mubr.f32.vlgmr.msra.gmra.mrb[0].mxu0 %v551_v16  ;;  %v4778_v2 = vpack.c.bf16 %v950_v59, %v946_v58  ;;  %v952_v3 = vld [vmem:[%s4561_s3 + $0x148] sm:$0xff]  ;;  %v555_v5 = vld [vmem:[#allocation2 + $0x20] sm:$0xff]  ;;  %v4783_v6 = vpack.c.bf16 %v947_v62, %v943_v61  ;;  %v954_v7 = vld [vmem:[%s4561_s3 + $0x158] sm:$0xff]  ;;  %v4789_v10 = vpack.c.bf16 %v949_v1, %v945_v0  ;;  %v625_v62 = vlaneseq }
 0x180   : > { %823 = vmatmul.mubr.f32.vlgmr.msra.gmra.mrb[0].mxu1 %v551_v16  ;;  %3351 = vmatpush1.bf16.msra.mxu0 %v4698_v17  ;;  %v956_v4 = vld [vmem:[%s4561_s3 + $0x168] sm:$0xff]  ;;  %v958_v9 = vld [vmem:[%s4561_s3 + $0x178] sm:$0xff]  ;;  %v951_v12 = vld [vmem:[%s4561_s3 + $0x140] sm:$0xff] }
 0x181   : > { %3383 = vmatpush1.bf16.msra.mxu1 %v4703_v20  ;;  %715 = vmatprep.mubr.f32.mxu0 %v4340_v41  ;;  %v955_v13 = vld [vmem:[%s4561_s3 + $0x160] sm:$0xff]  ;;  %v4795_v14 = vpack.c.bf16 %v956_v4, %v952_v3  ;;  %v953_v15 = vld [vmem:[%s4561_s3 + $0x150] sm:$0xff]  ;;  %v4800_v18 = vpack.c.bf16 %v958_v9, %v954_v7  ;;  %v960_v19 = vld [vmem:[%s4561_s3 + $0x188] sm:$0xff]  ;;  %v626_v0 = vshrl.u32 %v625_v62, 7 }
 0x182   : > { %828 = vmatprep.mubr.f32.mxu1 %v4340_v41  ;;  %3353 = vmatprep.subr.bf16.mxu0 %v4708_v23  ;;  %v957_v16 = vld [vmem:[%s4561_s3 + $0x170] sm:$0xff]  ;;  %v964_v21 = vld [vmem:[%s4561_s3 + $0x1a8] sm:$0xff]  ;;  %v4805_v24 = vpack.c.bf16 %v955_v13, %v951_v12  ;;  %v962_v25 = vld [vmem:[%s4561_s3 + $0x198] sm:$0xff] }
 0x183   : > { %716 = vmatmul.mubr.f32.gmra.mrb[2].mxu0 %v552_v29  ;;  %3385 = vmatprep.subr.bf16.mxu1 %v4712_v26  ;;  %v556_v22 = vld [vmem:[#allocation2 + $0x28] sm:$0xff]  ;;  %v966_v27 = vld [vmem:[%s4561_s3 + $0x1b8] sm:$0xff]  ;;  %v4811_v28 = vpack.c.bf16 %v957_v16, %v953_v15  ;;  %v963_v31 = vld [vmem:[%s4561_s3 + $0x1a0] sm:$0xff]  ;;  %v4817_v32 = vpack.c.bf16 %v964_v21, %v960_v19  ;;  %v627_v1 = vsub.s32 0, %v626_v0  ;;  %v631_v4 = vsub.s32 1, %v626_v0 }
 0x184   : > { %829 = vmatmul.mubr.f32.gmra.mrb[2].mxu1 %v552_v29  ;;  %3355 = vmatpush1.bf16.msra.mxu0 %v4717_v30  ;;  %v959_v29 = vld [vmem:[%s4561_s3 + $0x180] sm:$0xff]  ;;  %v961_v34 = vld [vmem:[%s4561_s3 + $0x190] sm:$0xff]  ;;  %v4822_v37 = vpack.c.bf16 %v966_v27, %v962_v25  ;;  %v968_v38 = vld [vmem:[%s4561_s3 + $0x1c8] sm:$0xff]  ;;  %v639_v12 = vsub.s32 3, %v626_v0  ;;  %v635_v25 = vsub.s32 2, %v626_v0 }
 0x185   : > { %3387 = vmatpush1.bf16.msra.mxu1 %v4723_v33  ;;  %721 = vmatprep.mubr.f32.mxu0 %v4340_v41  ;;  %v965_v35 = vld [vmem:[%s4561_s3 + $0x1b0] sm:$0xff]  ;;  %v972_v40 = vld [vmem:[%s4561_s3 + $0x1e8] sm:$0xff]  ;;  %v970_v45 = vld [vmem:[%s4561_s3 + $0x1d8] sm:$0xff] }
 0x186   : > { %834 = vmatprep.mubr.f32.mxu1 %v4340_v41  ;;  %3357 = vmatprep.subr.bf16.mxu0 %v4729_v36  ;;  %v557_v42 = vld [vmem:[#allocation2 + $0x30] sm:$0xff]  ;;  %v974_v46 = vld [vmem:[%s4561_s3 + $0x1f8] sm:$0xff]  ;;  %v4833_v48 = vpack.c.bf16 %v965_v35, %v961_v34  ;;  %v967_v49 = vld [vmem:[%s4561_s3 + $0x1c0] sm:$0xff]  ;;  %v4839_v52 = vpack.c.bf16 %v972_v40, %v968_v38 }
 0x187   : > { %722 = vmatmul.mubr.f32.gmra.mrb[4].mxu0 %v553_v43  ;;  %3389 = vmatprep.subr.bf16.mxu1 %v4734_v39  ;;  %v971_v51 = vld [vmem:[%s4561_s3 + $0x1e0] sm:$0xff]  ;;  %v969_v54 = vld [vmem:[%s4561_s3 + $0x1d0] sm:$0xff]  ;;  %v558_v58 = vld [vmem:[#allocation2 + $0x38] sm:$0xff] }
 0x188   : > { %835 = vmatmul.mubr.f32.gmra.mrb[4].mxu1 %v553_v43  ;;  %3359 = vmatpush1.bf16.msra.mxu0 %v4739_v44  ;;  %v4827_v43 = vpack.c.bf16 %v963_v31, %v959_v29  ;;  %v973_v55 = vld [vmem:[%s4561_s3 + $0x1f0] sm:$0xff]  ;;  %v4847_v59 = vpack.c.bf16 %v971_v51, %v967_v49  ;;  %v623_v3 = vld [vmem:[%s4576_s27] sm:$0xf] }
 0x189   : > { %3391 = vmatpush1.bf16.msra.mxu1 %v4745_v47  ;;  %727 = vmatprep.mubr.f32.mxu0 %v4340_v41  ;;  %v4851_v61 = vpack.c.bf16 %v973_v55, %v969_v54  ;;  %v4901_v7 = vrot.slane %v623_v3, %v631_v4  ;;  %v4908_v29 = vrot.slane %v623_v3, %v635_v25 }
 0x18a   : > { %840 = vmatprep.mubr.f32.mxu1 %v4340_v41  ;;  %3361 = vmatprep.subr.bf16.mxu0 %v4751_v50 }
 0x18b   : > { %728 = vmatmul.mubr.f32.gmra.mrb[6].mxu0 %v554_v56  ;;  %3393 = vmatprep.subr.bf16.mxu1 %v4756_v53 }
 0x18c   : > { %841 = vmatmul.mubr.f32.gmra.mrb[6].mxu1 %v554_v56  ;;  %3363 = vmatpush1.bf16.msra.mxu0 %v4761_v57  ;;  %v4844_v56 = vpack.c.bf16 %v974_v46, %v970_v45 }
 0x18d   : > { %3395 = vmatpush1.bf16.msra.mxu1 %v4767_v60  ;;  %733 = vmatprep.mubr.f32.mxu0 %v4340_v41 }
 0x18e   : > { %846 = vmatprep.mubr.f32.mxu1 %v4340_v41  ;;  %3365 = vmatprep.subr.bf16.mxu0 %v4773_v63 }
 0x18f   : > { %734 = vmatmul.mubr.f32.gmra.mrb[8].mxu0 %v555_v5  ;;  %3397 = vmatprep.subr.bf16.mxu1 %v4778_v2 }
 0x190   : > { %847 = vmatmul.mubr.f32.gmra.mrb[8].mxu1 %v555_v5  ;;  %3367 = vmatpush1.bf16.msra.mxu0 %v4783_v6  ;;  %v4899_v5 = vrot.slane %v623_v3, %v627_v1 }
 0x191   : > { %3399 = vmatpush1.bf16.msra.mxu1 %v4789_v10  ;;  %739 = vmatprep.mubr.f32.mxu0 %v4340_v41 }
 0x192   : > { %852 = vmatprep.mubr.f32.mxu1 %v4340_v41  ;;  %3369 = vmatprep.subr.bf16.mxu0 %v4795_v14 }
 0x193   : > { %740 = vmatmul.mubr.f32.gmra.mrb[10].mxu0 %v556_v22  ;;  %3401 = vmatprep.subr.bf16.mxu1 %v4800_v18 }
 0x194   : > { %853 = vmatmul.mubr.f32.gmra.mrb[10].mxu1 %v556_v22  ;;  %3371 = vmatpush1.bf16.msra.mxu0 %v4805_v24  ;;  %v4905_v22 = vrot.slane %v623_v3, %v639_v12 }
 0x195   : > { %3403 = vmatpush1.bf16.msra.mxu1 %v4811_v28  ;;  %745 = vmatprep.mubr.f32.mxu0 %v4340_v41 }
 0x196   : > { %858 = vmatprep.mubr.f32.mxu1 %v4340_v41  ;;  %3373 = vmatprep.subr.bf16.mxu0 %v4817_v32 }
 0x197   : > { %746 = vmatmul.mubr.f32.gmra.mrb[12].mxu0 %v557_v42  ;;  %3405 = vmatprep.subr.bf16.mxu1 %v4822_v37 }
 0x198   : > { %859 = vmatmul.mubr.f32.gmra.mrb[12].mxu1 %v557_v42  ;;  %3375 = vmatpush1.bf16.msra.mxu0 %v4827_v43 }
 0x199   : > { %3407 = vmatpush1.bf16.msra.mxu1 %v4833_v48  ;;  %751 = vmatprep.mubr.f32.mxu0 %v4340_v41 }
 0x19a   : > { %864 = vmatprep.mubr.f32.mxu1 %v4340_v41  ;;  %3377 = vmatprep.subr.bf16.mxu0 %v4839_v52 }
 0x19b   : > { %752 = vmatmul.mubr.f32.gmra.mrb[14].mxu0 %v558_v58  ;;  %3409 = vmatprep.subr.bf16.mxu1 %v4844_v56 }
 0x19c   : > { %865 = vmatmul.mubr.f32.gmra.mrb[14].mxu1 %v558_v58  ;;  %3379 = vmatpush1.bf16.msra.mxu0 %v4847_v59 }
 0x19d   : > { %3411 = vmatpush1.bf16.msra.mxu1 %v4851_v61  ;;  %1039 = vmatprep.mubr.f32.mxu0 %v4340_v41 }
 0x19e   : > { %1110 = vmatprep.mubr.f32.mxu1 %v4340_v41  ;;  %3413 = vmatprep.subr.bf16.mxu0 %v4688_v8 }
 0x19f   : > { %1040 = vmatmul.mubr.f32.vlgmr.msra.gmra.mrb[0].mxu0 %v4340_v41  ;;  %3445 = vmatprep.subr.bf16.mxu1 %v4692_v11 }
 0x1a0   : > { %1111 = vmatmul.mubr.f32.vlgmr.msra.gmra.mrb[0].mxu1 %v4340_v41  ;;  %3415 = vmatpush1.bf16.msra.mxu0 %v4698_v17 }
 0x1a1   : > { %3447 = vmatpush1.bf16.msra.mxu1 %v4703_v20  ;;  %3417 = vmatprep.subr.bf16.mxu0 %v4708_v23 }
 0x1a2   : > { %3449 = vmatprep.subr.bf16.mxu1 %v4712_v26  ;;  %1285 = vmatprep.mubr.f32.mxu0 %v4340_v41 }
 0x1a3   : > { %1356 = vmatprep.mubr.f32.mxu1 %v4340_v41 }
 0x1a4   : > { %3419 = vmatpush1.bf16.msra.mxu0 %v4717_v30 }
 0x1a5   : > { %3451 = vmatpush1.bf16.msra.mxu1 %v4723_v33  ;;  %3421 = vmatprep.subr.bf16.mxu0 %v4729_v36 }
 0x1a6   : > { %3453 = vmatprep.subr.bf16.mxu1 %v4734_v39 }
 0x1a8   : > { %3423 = vmatpush1.bf16.msra.mxu0 %v4739_v44 }
 0x1a9   : > { %3455 = vmatpush1.bf16.msra.mxu1 %v4745_v47  ;;  %3425 = vmatprep.subr.bf16.mxu0 %v4751_v50 }
 0x1aa   : > { %3457 = vmatprep.subr.bf16.mxu1 %v4756_v53 }
 0x1ac   : > { %3427 = vmatpush1.bf16.msra.mxu0 %v4761_v57 }
 0x1ad   : > { %3459 = vmatpush1.bf16.msra.mxu1 %v4767_v60  ;;  %3429 = vmatprep.subr.bf16.mxu0 %v4773_v63 }
 0x1ae   : > { %3461 = vmatprep.subr.bf16.mxu1 %v4778_v2 }
 0x1b0   : > { %3431 = vmatpush1.bf16.msra.mxu0 %v4783_v6 }
 0x1b1   : > { %3463 = vmatpush1.bf16.msra.mxu1 %v4789_v10  ;;  %3433 = vmatprep.subr.bf16.mxu0 %v4795_v14 }
 0x1b2   : > { %3465 = vmatprep.subr.bf16.mxu1 %v4800_v18 }
 0x1b4   : > { %3435 = vmatpush1.bf16.msra.mxu0 %v4805_v24 }
 0x1b5   : > { %3467 = vmatpush1.bf16.msra.mxu1 %v4811_v28  ;;  %3437 = vmatprep.subr.bf16.mxu0 %v4817_v32 }
 0x1b6   : > { %3469 = vmatprep.subr.bf16.mxu1 %v4822_v37 }
 0x1b8   : > { %3439 = vmatpush1.bf16.msra.mxu0 %v4827_v43 }
 0x1b9   : > { %3471 = vmatpush1.bf16.msra.mxu1 %v4833_v48  ;;  %3441 = vmatprep.subr.bf16.mxu0 %v4839_v52 }
 0x1ba   : > { %3473 = vmatprep.subr.bf16.mxu1 %v4844_v56 }
 0x1bc   : > { %3443 = vmatpush1.bf16.msra.mxu0 %v4847_v59 }
 0x1bd   : > { %3475 = vmatpush1.bf16.msra.mxu1 %v4851_v61  ;;  %3477 = vmatprep.subr.bf16.mxu0 %v4688_v8 }
 0x1be   : > { %3509 = vmatprep.subr.bf16.mxu1 %v4692_v11 }
 0x272   : > { %v1041_v9 = vpop.f32.mrb[0].mxu0 }
 0x273   : > { %v3894_v13 = vadd.f32 %v1041_v9, %v4899_v5  ;;  %v1112_v15 = vpop.f32.mrb[0].mxu1  ;;  %v1043_v16 = vpop.f32.mrb[1].mxu0 }
 0x274   : > { %v3895_v19 = vadd.f32 %v1043_v16, %v4901_v7  ;;  %v1114_v8 = vpop.f32.mrb[1].mxu1  ;;  %v3910_v34 = vadd.f32 %v1112_v15, %v4908_v29 }
 0x275   : > { %v3161_v21 = vmul.f32 -1.442695, %v3894_v13  ;;  %v3911_v27 = vadd.f32 %v1114_v8, %v4905_v22 }
 0x276   : > { %v3162_v11 = vmul.f32 -1.442695, %v3895_v19 }
 0x277   : > { %4043 = vpow2.f32 %v3161_v21  ;;  %v3163_v31 = vmul.f32 -1.442695, %v3911_v27 }
 0x278   : > { %4045 = vpow2.f32 %v3162_v11 }
 0x279   : > { %4047 = vpow2.f32 %v3163_v31 }
 0x27a   : > { %4049 = vtanh.f32 %v3910_v34 }
 0x281   : > { %v4044_v35 = vpop.eup %4043 }
 0x282   : > { %v4046_v38 = vpop.eup %4045  ;;  %v1124_v40 = vadd.f32 1.0, %v4044_v35 }
 0x283   : > { %v1130_v42 = vadd.f32 1.0, %v4046_v38  ;;  %v4048_v45 = vpop.eup %4047 }
 0x284   : > { %4051 = vrcp.f32 %v1124_v40  ;;  %v4050_v46 = vpop.eup %4049  ;;  %v1137_v55 = vadd.f32 1.0, %v4048_v45 }
 0x285   : > { %4053 = vrcp.f32 %v1130_v42 }
 0x286   : > { %4055 = vrcp.f32 %v1137_v55 }
 0x28e   : > { %v4052_v49 = vpop.eup %4051 }
 0x28f   : > { %v4054_v51 = vpop.eup %4053  ;;  %v1142_v54 = vmul.f32 %v4052_v49, %v4050_v46  ;;  %v1652_v49 = vld [vmem:[%s4561_s3 + $0x8] sm:$0xff] }
 0x290   : > { %v1141_v58 = vmul.f32 0.0, %v4054_v51  ;;  %v4056_v0 = vpop.eup %4055  ;;  %v1656_v51 = vld [vmem:[%s4561_s3 + $0x28] sm:$0xff] }
 0x291   : > { %v4959_v55 = vpack.c.bf16 %v1656_v51, %v1652_v49  ;;  %v1916_v49 = vld [vmem:[%s4561_s3 + $0x90] sm:$0xff] }
 0x292   : > { %v4911_v62 = vadd.f32 %v1142_v54, %v1141_v58  ;;  %v1654_v54 = vld [vmem:[%s4561_s3 + $0x18] sm:$0xff]  ;;  %v1920_v51 = vld [vmem:[%s4561_s3 + $0xb0] sm:$0xff] }
 0x293   : > { %v1658_v58 = vld [vmem:[%s4561_s3 + $0x38] sm:$0xff] }
 0x294   : > { %4057 = vtanh.f32 %v4911_v62 }
 0x29e   : > { %v4058_v1 = vpop.eup %4057 }
 0x29f   : > { %v1145_v3 = vmul.f32 %v4058_v1, %v4056_v0  ;;  %v1655_v0 = vld [vmem:[%s4561_s3 + $0x20] sm:$0xff]  ;;  %v4964_v1 = vpack.c.bf16 %v1658_v58, %v1654_v54  ;;  %v5053_v54 = vpack.c.bf16 %v1920_v51, %v1916_v49  ;;  %v1923_v58 = vld [vmem:[%s4561_s3 + $0xc8] sm:$0xff]  ;;  %v1948_v49 = vld [vmem:[%s4561_s3 + $0x190] sm:$0xff] }
 0x2a1   : > { %1148 = vst [vmem:[#allocation2] sm:$0xff] %v1145_v3  ;;  %1286 = vmatmul.mubr.f32.vlgmr.msra.gmra.mrb[2].mxu0 %v1145_v3  ;;  %1357 = vmatmul.mubr.f32.vlgmr.msra.gmra.mrb[2].mxu1 %v1145_v3 }
 0x2a2   : > { %3479 = vmatpush1.bf16.msra.mxu0 %v4698_v17  ;;  %3511 = vmatpush1.bf16.msra.mxu1 %v4703_v20 }
 0x2a3   : > { %3481 = vmatprep.subr.bf16.mxu0 %v4708_v23  ;;  %3513 = vmatprep.subr.bf16.mxu1 %v4712_v26 }
 0x2a4   : > { %1532 = vmatprep.mubr.f32.mxu0 %v4340_v41  ;;  %1603 = vmatprep.mubr.f32.mxu1 %v4340_v41 }
 0x2a6   : > { %3483 = vmatpush1.bf16.msra.mxu0 %v4717_v30  ;;  %3515 = vmatpush1.bf16.msra.mxu1 %v4723_v33 }
 0x2a7   : > { %3485 = vmatprep.subr.bf16.mxu0 %v4729_v36  ;;  %3517 = vmatprep.subr.bf16.mxu1 %v4734_v39 }
 0x2aa   : > { %3487 = vmatpush1.bf16.msra.mxu0 %v4739_v44  ;;  %3519 = vmatpush1.bf16.msra.mxu1 %v4745_v47 }
 0x2ab   : > { %3489 = vmatprep.subr.bf16.mxu0 %v4751_v50  ;;  %3521 = vmatprep.subr.bf16.mxu1 %v4756_v53 }
 0x2ae   : > { %3491 = vmatpush1.bf16.msra.mxu0 %v4761_v57  ;;  %3523 = vmatpush1.bf16.msra.mxu1 %v4767_v60 }
 0x2af   : > { %3493 = vmatprep.subr.bf16.mxu0 %v4773_v63  ;;  %3525 = vmatprep.subr.bf16.mxu1 %v4778_v2 }
 0x2b2   : > { %3495 = vmatpush1.bf16.msra.mxu0 %v4783_v6  ;;  %3527 = vmatpush1.bf16.msra.mxu1 %v4789_v10 }
 0x2b3   : > { %3497 = vmatprep.subr.bf16.mxu0 %v4795_v14  ;;  %3529 = vmatprep.subr.bf16.mxu1 %v4800_v18 }
 0x2b6   : > { %3499 = vmatpush1.bf16.msra.mxu0 %v4805_v24  ;;  %3531 = vmatpush1.bf16.msra.mxu1 %v4811_v28 }
 0x2b7   : > { %3501 = vmatprep.subr.bf16.mxu0 %v4817_v32  ;;  %3533 = vmatprep.subr.bf16.mxu1 %v4822_v37 }
 0x2ba   : > { %3503 = vmatpush1.bf16.msra.mxu0 %v4827_v43  ;;  %3535 = vmatpush1.bf16.msra.mxu1 %v4833_v48 }
 0x2bb   : > { %3505 = vmatprep.subr.bf16.mxu0 %v4839_v52  ;;  %3537 = vmatprep.subr.bf16.mxu1 %v4844_v56 }
 0x2be   : > { %3507 = vmatpush1.bf16.msra.mxu0 %v4847_v59  ;;  %3539 = vmatpush1.bf16.msra.mxu1 %v4851_v61 }
 0x2bf   : > { %3541 = vmatprep.subr.bf16.mxu0 %v4959_v55  ;;  %3573 = vmatprep.subr.bf16.mxu1 %v4964_v1 }
 0x374   : > { %v1287_v17 = vpop.f32.mrb[2].mxu0  ;;  %v1358_v20 = vpop.f32.mrb[2].mxu1 }
 0x375   : > { %v3896_v23 = vadd.f32 %v1287_v17, %v4899_v5  ;;  %v1289_v26 = vpop.f32.mrb[3].mxu0  ;;  %v1360_v30 = vpop.f32.mrb[3].mxu1  ;;  %v3912_v15 = vadd.f32 %v1358_v20, %v4908_v29  ;;  %v1653_v17 = vld [vmem:[%s4561_s3 + $0x10] sm:$0xff] }
 0x376   : > { %v3897_v33 = vadd.f32 %v1289_v26, %v4901_v7  ;;  %v3913_v12 = vadd.f32 %v1360_v30, %v4905_v22  ;;  %v1657_v20 = vld [vmem:[%s4561_s3 + $0x30] sm:$0xff]  ;;  %v1660_v26 = vld [vmem:[%s4561_s3 + $0x48] sm:$0xff] }
 0x377   : > { %v3164_v4 = vmul.f32 -1.442695, %v3896_v23  ;;  %v4971_v23 = vpack.c.bf16 %v1657_v20, %v1653_v17  ;;  %v1664_v30 = vld [vmem:[%s4561_s3 + $0x68] sm:$0xff]  ;;  %v1929_v20 = vld [vmem:[%s4561_s3 + $0xf8] sm:$0xff] }
 0x378   : > { %v3165_v9 = vmul.f32 -1.442695, %v3897_v33  ;;  %v3166_v13 = vmul.f32 -1.442695, %v3913_v12  ;;  %v1662_v33 = vld [vmem:[%s4561_s3 + $0x58] sm:$0xff]  ;;  %v1659_v12 = vld [vmem:[%s4561_s3 + $0x40] sm:$0xff] }
 0x379   : > { %4059 = vpow2.f32 %v3164_v4  ;;  %v4979_v4 = vpack.c.bf16 %v1664_v30, %v1660_v26  ;;  %v1922_v26 = vld [vmem:[%s4561_s3 + $0xc0] sm:$0xff] }
 0x37a   : > { %4061 = vpow2.f32 %v3165_v9  ;;  %v1666_v9 = vld [vmem:[%s4561_s3 + $0x78] sm:$0xff]  ;;  %v1926_v30 = vld [vmem:[%s4561_s3 + $0xe0] sm:$0xff] }
 0x37b   : > { %4063 = vpow2.f32 %v3166_v13  ;;  %v1663_v13 = vld [vmem:[%s4561_s3 + $0x60] sm:$0xff] }
 0x37c   : > { %4065 = vtanh.f32 %v3912_v15  ;;  %v4984_v15 = vpack.c.bf16 %v1666_v9, %v1662_v33  ;;  %v5068_v9 = vpack.c.bf16 %v1926_v30, %v1922_v26  ;;  %v1957_v30 = vld [vmem:[%s4561_s3 + $0x1d8] sm:$0xff] }
 0x383   : > { %v4060_v16 = vpop.eup %4059 }
 0x384   : > { %v4062_v19 = vpop.eup %4061  ;;  %v1370_v8 = vadd.f32 1.0, %v4060_v16  ;;  %v4986_v16 = vpack.c.bf16 %v1663_v13, %v1659_v12  ;;  %v1924_v12 = vld [vmem:[%s4561_s3 + $0xd0] sm:$0xff] }
 0x385   : > { %v1376_v21 = vadd.f32 1.0, %v4062_v19  ;;  %v4064_v11 = vpop.eup %4063  ;;  %v1661_v19 = vld [vmem:[%s4561_s3 + $0x50] sm:$0xff] }
 0x386   : > { %4067 = vrcp.f32 %v1370_v8  ;;  %v4066_v25 = vpop.eup %4065  ;;  %v1383_v35 = vadd.f32 1.0, %v4064_v11  ;;  %v1665_v8 = vld [vmem:[%s4561_s3 + $0x70] sm:$0xff] }
 0x387   : > { %4069 = vrcp.f32 %v1376_v21  ;;  %v4991_v21 = vpack.c.bf16 %v1665_v8, %v1661_v19  ;;  %v1928_v13 = vld [vmem:[%s4561_s3 + $0xf0] sm:$0xff]  ;;  %v1931_v8 = vld [vmem:[%s4561_s3 + $0x108] sm:$0xff] }
 0x388   : > { %4071 = vrcp.f32 %v1383_v35  ;;  %v5073_v19 = vpack.c.bf16 %v1928_v13, %v1924_v12  ;;  %v1961_v12 = vld [vmem:[%s4561_s3 + $0x1f8] sm:$0xff]  ;;  %v1954_v13 = vld [vmem:[%s4561_s3 + $0x1c0] sm:$0xff] }
 0x390   : > { %v4068_v27 = vpop.eup %4067 }
 0x391   : > { %v4070_v31 = vpop.eup %4069  ;;  %v1388_v34 = vmul.f32 %v4068_v27, %v4066_v25  ;;  %v1915_v27 = vld [vmem:[%s4561_s3 + $0x88] sm:$0xff] }
 0x392   : > { %v1387_v38 = vmul.f32 %v4070_v31, %v4911_v62  ;;  %v4072_v42 = vpop.eup %4071  ;;  %v1651_v62 = vld [vmem:[%s4561_s3] sm:$0xff]  ;;  %v1919_v31 = vld [vmem:[%s4561_s3 + $0xa8] sm:$0xff] }
 0x393   : > { %v4966_v3 = vpack.c.bf16 %v1655_v0, %v1651_v62  ;;  %v5041_v35 = vpack.c.bf16 %v1919_v31, %v1915_v27  ;;  %v1927_v62 = vld [vmem:[%s4561_s3 + $0xe8] sm:$0xff]  ;;  %v1925_v0 = vld [vmem:[%s4561_s3 + $0xd8] sm:$0xff] }
 0x394   : > { %v4951_v40 = vadd.f32 %v1388_v34, %v1387_v38  ;;  %v1917_v34 = vld [vmem:[%s4561_s3 + $0x98] sm:$0xff]  ;;  %v5061_v17 = vpack.c.bf16 %v1927_v62, %v1923_v58  ;;  %v5066_v33 = vpack.c.bf16 %v1929_v20, %v1925_v0  ;;  %v1952_v58 = vld [vmem:[%s4561_s3 + $0x1b0] sm:$0xff]  ;;  %v1955_v62 = vld [vmem:[%s4561_s3 + $0x1c8] sm:$0xff] }
 0x395   : > { %v1921_v38 = vld [vmem:[%s4561_s3 + $0xb8] sm:$0xff]  ;;  %v1959_v0 = vld [vmem:[%s4561_s3 + $0x1e8] sm:$0xff]  ;;  %v5135_v20 = vpack.c.bf16 %v1952_v58, %v1948_v49 }
 0x396   : > { %4073 = vtanh.f32 %v4951_v40  ;;  %v1949_v27 = vld [vmem:[%s4561_s3 + $0x198] sm:$0xff]  ;;  %v5137_v26 = vpack.c.bf16 %v1959_v0, %v1955_v62 }
 0x397   : > { %v1953_v31 = vld [vmem:[%s4561_s3 + $0x1b8] sm:$0xff] }
 0x3a0   : > { %v4074_v45 = vpop.eup %4073 }
 0x3a1   : > { %v1391_v46 = vmul.f32 %v4074_v45, %v4072_v42  ;;  %v1918_v42 = vld [vmem:[%s4561_s3 + $0xa0] sm:$0xff]  ;;  %v5046_v45 = vpack.c.bf16 %v1921_v38, %v1917_v34  ;;  %v5122_v38 = vpack.c.bf16 %v1953_v31, %v1949_v27 }
 0x3a3   : > { %1395 = vst [vmem:[#allocation2 + $0x8] sm:$0xff] %v1391_v46  ;;  %1533 = vmatmul.mubr.f32.vlgmr.msra.gmra.mrb[4].mxu0 %v1391_v46  ;;  %1604 = vmatmul.mubr.f32.vlgmr.msra.gmra.mrb[4].mxu1 %v1391_v46 }
 0x3a4   : > { %1779 = vmatprep.mubr.f32.mxu0 %v4340_v41  ;;  %1850 = vmatprep.mubr.f32.mxu1 %v4340_v41 }
 0x3a5   : > { %3543 = vmatpush1.bf16.msra.mxu0 %v4966_v3  ;;  %3575 = vmatpush1.bf16.msra.mxu1 %v4971_v23 }
 0x3a6   : > { %3545 = vmatprep.subr.bf16.mxu0 %v4979_v4  ;;  %3577 = vmatprep.subr.bf16.mxu1 %v4984_v15 }
 0x3a9   : > { %3547 = vmatpush1.bf16.msra.mxu0 %v4986_v16  ;;  %3579 = vmatpush1.bf16.msra.mxu1 %v4991_v21 }
 0x3aa   : > { %3549 = vmatprep.subr.bf16.mxu0 %v4729_v36  ;;  %3581 = vmatprep.subr.bf16.mxu1 %v4734_v39 }
 0x3ad   : > { %3551 = vmatpush1.bf16.msra.mxu0 %v4739_v44  ;;  %3583 = vmatpush1.bf16.msra.mxu1 %v4745_v47 }
 0x3ae   : > { %3553 = vmatprep.subr.bf16.mxu0 %v4751_v50  ;;  %3585 = vmatprep.subr.bf16.mxu1 %v4756_v53 }
 0x3b1   : > { %3555 = vmatpush1.bf16.msra.mxu0 %v4761_v57  ;;  %3587 = vmatpush1.bf16.msra.mxu1 %v4767_v60 }
 0x3b2   : > { %3557 = vmatprep.subr.bf16.mxu0 %v4773_v63  ;;  %3589 = vmatprep.subr.bf16.mxu1 %v4778_v2 }
 0x3b5   : > { %3559 = vmatpush1.bf16.msra.mxu0 %v4783_v6  ;;  %3591 = vmatpush1.bf16.msra.mxu1 %v4789_v10 }
 0x3b6   : > { %3561 = vmatprep.subr.bf16.mxu0 %v4795_v14  ;;  %3593 = vmatprep.subr.bf16.mxu1 %v4800_v18 }
 0x3b9   : > { %3563 = vmatpush1.bf16.msra.mxu0 %v4805_v24  ;;  %3595 = vmatpush1.bf16.msra.mxu1 %v4811_v28 }
 0x3ba   : > { %3565 = vmatprep.subr.bf16.mxu0 %v4817_v32  ;;  %3597 = vmatprep.subr.bf16.mxu1 %v4822_v37 }
 0x3bd   : > { %3567 = vmatpush1.bf16.msra.mxu0 %v4827_v43  ;;  %3599 = vmatpush1.bf16.msra.mxu1 %v4833_v48 }
 0x3be   : > { %3569 = vmatprep.subr.bf16.mxu0 %v4839_v52  ;;  %3601 = vmatprep.subr.bf16.mxu1 %v4844_v56 }
 0x3c1   : > { %3571 = vmatpush1.bf16.msra.mxu0 %v4847_v59  ;;  %3603 = vmatpush1.bf16.msra.mxu1 %v4851_v61 }
 0x3c2   : > { %3605 = vmatprep.subr.bf16.mxu0 %v4959_v55  ;;  %3637 = vmatprep.subr.bf16.mxu1 %v4964_v1 }
 0x476   : > { %v1534_v36 = vpop.f32.mrb[4].mxu0  ;;  %v1605_v39 = vpop.f32.mrb[4].mxu1 }
 0x477   : > { %v3898_v44 = vadd.f32 %v1534_v36, %v4899_v5  ;;  %v1536_v47 = vpop.f32.mrb[5].mxu0  ;;  %v1607_v50 = vpop.f32.mrb[5].mxu1  ;;  %v3914_v6 = vadd.f32 %v1605_v39, %v4908_v29  ;;  %v1935_v36 = vld [vmem:[%s4561_s3 + $0x128] sm:$0xff]  ;;  %v1933_v39 = vld [vmem:[%s4561_s3 + $0x118] sm:$0xff] }
 0x478   : > { %v3899_v53 = vadd.f32 %v1536_v47, %v4901_v7  ;;  %v3915_v63 = vadd.f32 %v1607_v50, %v4905_v22  ;;  %v1937_v47 = vld [vmem:[%s4561_s3 + $0x138] sm:$0xff]  ;;  %v1930_v50 = vld [vmem:[%s4561_s3 + $0x100] sm:$0xff] }
 0x479   : > { %v3167_v57 = vmul.f32 -1.442695, %v3898_v44  ;;  %v5081_v44 = vpack.c.bf16 %v1935_v36, %v1931_v8  ;;  %v5143_v8 = vpack.c.bf16 %v1961_v12, %v1957_v30  ;;  %v1958_v36 = vld [vmem:[%s4561_s3 + $0x1e0] sm:$0xff] }
 0x47a   : > { %v3168_v60 = vmul.f32 -1.442695, %v3899_v53  ;;  %v3169_v2 = vmul.f32 -1.442695, %v3915_v63  ;;  %v1934_v53 = vld [vmem:[%s4561_s3 + $0x120] sm:$0xff]  ;;  %v1932_v63 = vld [vmem:[%s4561_s3 + $0x110] sm:$0xff] }
 0x47b   : > { %4075 = vpow2.f32 %v3167_v57  ;;  %v5086_v57 = vpack.c.bf16 %v1937_v47, %v1933_v39  ;;  %v1956_v39 = vld [vmem:[%s4561_s3 + $0x1d0] sm:$0xff] }
 0x47c   : > { %4077 = vpow2.f32 %v3168_v60  ;;  %v5088_v60 = vpack.c.bf16 %v1934_v53, %v1930_v50  ;;  %v1960_v47 = vld [vmem:[%s4561_s3 + $0x1f0] sm:$0xff]  ;;  %v5149_v50 = vpack.c.bf16 %v1958_v36, %v1954_v13 }
 0x47d   : > { %4079 = vpow2.f32 %v3169_v2  ;;  %v1936_v2 = vld [vmem:[%s4561_s3 + $0x130] sm:$0xff]  ;;  %v5153_v53 = vpack.c.bf16 %v1960_v47, %v1956_v39 }
 0x47e   : > { %4081 = vtanh.f32 %v3914_v6  ;;  %v5093_v6 = vpack.c.bf16 %v1936_v2, %v1932_v63 }
 0x485   : > { %v4076_v10 = vpop.eup %4075 }
 0x486   : > { %v4078_v14 = vpop.eup %4077  ;;  %v1617_v18 = vadd.f32 1.0, %v4076_v10  ;;  %v1939_v10 = vld [vmem:[%s4561_s3 + $0x148] sm:$0xff] }
 0x487   : > { %v1623_v24 = vadd.f32 1.0, %v4078_v14  ;;  %v4080_v28 = vpop.eup %4079  ;;  %v1943_v14 = vld [vmem:[%s4561_s3 + $0x168] sm:$0xff] }
 0x488   : > { %4083 = vrcp.f32 %v1617_v18  ;;  %v4082_v32 = vpop.eup %4081  ;;  %v1630_v52 = vadd.f32 1.0, %v4080_v28  ;;  %v1941_v18 = vld [vmem:[%s4561_s3 + $0x158] sm:$0xff] }
 0x489   : > { %4085 = vrcp.f32 %v1623_v24  ;;  %v5100_v24 = vpack.c.bf16 %v1943_v14, %v1939_v10  ;;  %v1945_v28 = vld [vmem:[%s4561_s3 + $0x178] sm:$0xff] }
 0x48a   : > { %4087 = vrcp.f32 %v1630_v52  ;;  %v1940_v52 = vld [vmem:[%s4561_s3 + $0x150] sm:$0xff] }
 0x492   : > { %v4084_v37 = vpop.eup %4083 }
 0x493   : > { %v4086_v43 = vpop.eup %4085  ;;  %v1635_v48 = vmul.f32 %v4084_v37, %v4082_v32  ;;  %v1938_v32 = vld [vmem:[%s4561_s3 + $0x140] sm:$0xff] }
 0x494   : > { %v1634_v56 = vmul.f32 %v4086_v43, %v4951_v40  ;;  %v4088_v61 = vpop.eup %4087  ;;  %v1914_v40 = vld [vmem:[%s4561_s3 + $0x80] sm:$0xff]  ;;  %v5106_v43 = vpack.c.bf16 %v1945_v28, %v1941_v18 }
 0x495   : > { %v5048_v46 = vpack.c.bf16 %v1918_v42, %v1914_v40  ;;  %v1942_v37 = vld [vmem:[%s4561_s3 + $0x160] sm:$0xff] }
 0x496   : > { %v5027_v59 = vadd.f32 %v1635_v48, %v1634_v56  ;;  %v5108_v48 = vpack.c.bf16 %v1942_v37, %v1938_v32  ;;  %v1944_v56 = vld [vmem:[%s4561_s3 + $0x170] sm:$0xff]  ;;  %v1946_v40 = vld [vmem:[%s4561_s3 + $0x180] sm:$0xff] }
 0x497   : > { %v1950_v42 = vld [vmem:[%s4561_s3 + $0x1a0] sm:$0xff] }
 0x498   : > { %4089 = vtanh.f32 %v5027_v59  ;;  %v5128_v51 = vpack.c.bf16 %v1950_v42, %v1946_v40 }
 0x4a2   : > { %v4090_v11 = vpop.eup %4089 }
 0x4a3   : > { %v1638_v25 = vmul.f32 %v4090_v11, %v4088_v61  ;;  %v1947_v61 = vld [vmem:[%s4561_s3 + $0x188] sm:$0xff]  ;;  %v5114_v11 = vpack.c.bf16 %v1944_v56, %v1940_v52 }
 0x4a5   : > { %1642 = vst [vmem:[#allocation2 + $0x10] sm:$0xff] %v1638_v25  ;;  %1780 = vmatmul.mubr.f32.vlgmr.msra.gmra.mrb[6].mxu0 %v1638_v25  ;;  %1851 = vmatmul.mubr.f32.vlgmr.msra.gmra.mrb[6].mxu1 %v1638_v25  ;;  %v1951_v25 = vld [vmem:[%s4561_s3 + $0x1a8] sm:$0xff] }
 0x4a6   : > { %3607 = vmatpush1.bf16.msra.mxu0 %v4966_v3  ;;  %3639 = vmatpush1.bf16.msra.mxu1 %v4971_v23  ;;  %v5120_v34 = vpack.c.bf16 %v1951_v25, %v1947_v61 }
 0x4a7   : > { %3609 = vmatprep.subr.bf16.mxu0 %v4979_v4  ;;  %3641 = vmatprep.subr.bf16.mxu1 %v4984_v15 }
 0x4a8   : > { %2026 = vmatprep.mubr.f32.mxu0 %v4340_v41  ;;  %2097 = vmatprep.mubr.f32.mxu1 %v4340_v41 }
 0x4aa   : > { %3611 = vmatpush1.bf16.msra.mxu0 %v4986_v16  ;;  %3643 = vmatpush1.bf16.msra.mxu1 %v4991_v21 }
 0x4ab   : > { %3613 = vmatprep.subr.bf16.mxu0 %v5041_v35  ;;  %3645 = vmatprep.subr.bf16.mxu1 %v5046_v45 }
 0x4ae   : > { %3615 = vmatpush1.bf16.msra.mxu0 %v5048_v46  ;;  %3647 = vmatpush1.bf16.msra.mxu1 %v5053_v54 }
 0x4af   : > { %3617 = vmatprep.subr.bf16.mxu0 %v5061_v17  ;;  %3649 = vmatprep.subr.bf16.mxu1 %v5066_v33 }
 0x4b2   : > { %3619 = vmatpush1.bf16.msra.mxu0 %v5068_v9  ;;  %3651 = vmatpush1.bf16.msra.mxu1 %v5073_v19 }
 0x4b3   : > { %3621 = vmatprep.subr.bf16.mxu0 %v5081_v44  ;;  %3653 = vmatprep.subr.bf16.mxu1 %v5086_v57 }
 0x4b6   : > { %3623 = vmatpush1.bf16.msra.mxu0 %v5088_v60  ;;  %3655 = vmatpush1.bf16.msra.mxu1 %v5093_v6 }
 0x4b7   : > { %3625 = vmatprep.subr.bf16.mxu0 %v5100_v24  ;;  %3657 = vmatprep.subr.bf16.mxu1 %v5106_v43 }
 0x4ba   : > { %3627 = vmatpush1.bf16.msra.mxu0 %v5108_v48  ;;  %3659 = vmatpush1.bf16.msra.mxu1 %v5114_v11 }
 0x4bb   : > { %3629 = vmatprep.subr.bf16.mxu0 %v5120_v34  ;;  %3661 = vmatprep.subr.bf16.mxu1 %v5122_v38 }
 0x4be   : > { %3631 = vmatpush1.bf16.msra.mxu0 %v5128_v51  ;;  %3663 = vmatpush1.bf16.msra.mxu1 %v5135_v20 }
 0x4bf   : > { %3633 = vmatprep.subr.bf16.mxu0 %v5137_v26  ;;  %3665 = vmatprep.subr.bf16.mxu1 %v5143_v8 }
 0x4c2   : > { %3635 = vmatpush1.bf16.msra.mxu0 %v5149_v50  ;;  %3667 = vmatpush1.bf16.msra.mxu1 %v5153_v53 }
 0x4c3   : > { %3669 = vmatprep.subr.bf16.mxu0 %v4959_v55  ;;  %3701 = vmatprep.subr.bf16.mxu1 %v4964_v1 }
 0x578   : > { %v1781_v63 = vpop.f32.mrb[6].mxu0  ;;  %v1852_v2 = vpop.f32.mrb[6].mxu1 }
 0x579   : > { %v3900_v10 = vadd.f32 %v1781_v63, %v4899_v5  ;;  %v1783_v14 = vpop.f32.mrb[7].mxu0  ;;  %v1854_v18 = vpop.f32.mrb[7].mxu1  ;;  %v3916_v61 = vadd.f32 %v1852_v2, %v4908_v29 }
 0x57a   : > { %v3901_v28 = vadd.f32 %v1783_v14, %v4901_v7  ;;  %v3917_v52 = vadd.f32 %v1854_v18, %v4905_v22 }
 0x57b   : > { %v3170_v32 = vmul.f32 -1.442695, %v3900_v10 }
 0x57c   : > { %v3171_v37 = vmul.f32 -1.442695, %v3901_v28  ;;  %v3172_v56 = vmul.f32 -1.442695, %v3917_v52 }
 0x57d   : > { %4091 = vpow2.f32 %v3170_v32 }
 0x57e   : > { %4093 = vpow2.f32 %v3171_v37 }
 0x57f   : > { %4095 = vpow2.f32 %v3172_v56 }
 0x580   : > { %4097 = vtanh.f32 %v3916_v61 }
 0x587   : > { %v4092_v25 = vpop.eup %4091 }
 0x588   : > { %v4094_v27 = vpop.eup %4093  ;;  %v1864_v31 = vadd.f32 1.0, %v4092_v25 }
 0x589   : > { %v1870_v40 = vadd.f32 1.0, %v4094_v27  ;;  %v4096_v42 = vpop.eup %4095 }
 0x58a   : > { %4099 = vrcp.f32 %v1864_v31  ;;  %v4098_v49 = vpop.eup %4097  ;;  %v1877_v30 = vadd.f32 1.0, %v4096_v42 }
 0x58b   : > { %4101 = vrcp.f32 %v1870_v40 }
 0x58c   : > { %4103 = vrcp.f32 %v1877_v30 }
 0x594   : > { %v4100_v58 = vpop.eup %4099 }
 0x595   : > { %v4102_v62 = vpop.eup %4101  ;;  %v1882_v0 = vmul.f32 %v4100_v58, %v4098_v49 }
 0x596   : > { %v1881_v12 = vmul.f32 %v4102_v62, %v5027_v59  ;;  %v4104_v36 = vpop.eup %4103 }
 0x598   : > { %v5165_v13 = vadd.f32 %v1882_v0, %v1881_v12 }
 0x59a   : > { %4105 = vtanh.f32 %v5165_v13 }
 0x5a4   : > { %v4106_v39 = vpop.eup %4105 }
 0x5a5   : > { %v1885_v47 = vmul.f32 %v4106_v39, %v4104_v36 }
 0x5a7   : > { %1889 = vst [vmem:[#allocation2 + $0x18] sm:$0xff] %v1885_v47  ;;  %2027 = vmatmul.mubr.f32.vlgmr.msra.gmra.mrb[8].mxu0 %v1885_v47  ;;  %2098 = vmatmul.mubr.f32.vlgmr.msra.gmra.mrb[8].mxu1 %v1885_v47 }
 0x5a8   : > { %3671 = vmatpush1.bf16.msra.mxu0 %v4966_v3  ;;  %3703 = vmatpush1.bf16.msra.mxu1 %v4971_v23 }
 0x5a9   : > { %3673 = vmatprep.subr.bf16.mxu0 %v4979_v4  ;;  %3705 = vmatprep.subr.bf16.mxu1 %v4984_v15 }
 0x5aa   : > { %2273 = vmatprep.mubr.f32.mxu0 %v4340_v41  ;;  %2344 = vmatprep.mubr.f32.mxu1 %v4340_v41 }
 0x5ac   : > { %3675 = vmatpush1.bf16.msra.mxu0 %v4986_v16  ;;  %3707 = vmatpush1.bf16.msra.mxu1 %v4991_v21 }
 0x5ad   : > { %3677 = vmatprep.subr.bf16.mxu0 %v5041_v35  ;;  %3709 = vmatprep.subr.bf16.mxu1 %v5046_v45 }
 0x5b0   : > { %3679 = vmatpush1.bf16.msra.mxu0 %v5048_v46  ;;  %3711 = vmatpush1.bf16.msra.mxu1 %v5053_v54 }
 0x5b1   : > { %3681 = vmatprep.subr.bf16.mxu0 %v5061_v17  ;;  %3713 = vmatprep.subr.bf16.mxu1 %v5066_v33 }
 0x5b4   : > { %3683 = vmatpush1.bf16.msra.mxu0 %v5068_v9  ;;  %3715 = vmatpush1.bf16.msra.mxu1 %v5073_v19 }
 0x5b5   : > { %3685 = vmatprep.subr.bf16.mxu0 %v5081_v44  ;;  %3717 = vmatprep.subr.bf16.mxu1 %v5086_v57 }
 0x5b8   : > { %3687 = vmatpush1.bf16.msra.mxu0 %v5088_v60  ;;  %3719 = vmatpush1.bf16.msra.mxu1 %v5093_v6 }
 0x5b9   : > { %3689 = vmatprep.subr.bf16.mxu0 %v5100_v24  ;;  %3721 = vmatprep.subr.bf16.mxu1 %v5106_v43 }
 0x5bc   : > { %3691 = vmatpush1.bf16.msra.mxu0 %v5108_v48  ;;  %3723 = vmatpush1.bf16.msra.mxu1 %v5114_v11 }
 0x5bd   : > { %3693 = vmatprep.subr.bf16.mxu0 %v5120_v34  ;;  %3725 = vmatprep.subr.bf16.mxu1 %v5122_v38 }
 0x5c0   : > { %3695 = vmatpush1.bf16.msra.mxu0 %v5128_v51  ;;  %3727 = vmatpush1.bf16.msra.mxu1 %v5135_v20 }
 0x5c1   : > { %3697 = vmatprep.subr.bf16.mxu0 %v5137_v26  ;;  %3729 = vmatprep.subr.bf16.mxu1 %v5143_v8 }
 0x5c4   : > { %3699 = vmatpush1.bf16.msra.mxu0 %v5149_v50  ;;  %3731 = vmatpush1.bf16.msra.mxu1 %v5153_v53 }
 0x5c5   : > { %3733 = vmatprep.subr.bf16.mxu0 %v4959_v55  ;;  %3765 = vmatprep.subr.bf16.mxu1 %v4964_v1 }
 0x67a   : > { %v2028_v59 = vpop.f32.mrb[8].mxu0  ;;  %v2099_v63 = vpop.f32.mrb[8].mxu1 }
 0x67b   : > { %v3902_v2 = vadd.f32 %v2028_v59, %v4899_v5  ;;  %v2030_v10 = vpop.f32.mrb[9].mxu0  ;;  %v2101_v14 = vpop.f32.mrb[9].mxu1  ;;  %v3918_v56 = vadd.f32 %v2099_v63, %v4908_v29 }
 0x67c   : > { %v3903_v18 = vadd.f32 %v2030_v10, %v4901_v7  ;;  %v3919_v37 = vadd.f32 %v2101_v14, %v4905_v22 }
 0x67d   : > { %v3173_v28 = vmul.f32 -1.442695, %v3902_v2 }
 0x67e   : > { %v3174_v32 = vmul.f32 -1.442695, %v3903_v18  ;;  %v3175_v52 = vmul.f32 -1.442695, %v3919_v37 }
 0x67f   : > { %4107 = vpow2.f32 %v3173_v28 }
 0x680   : > { %4109 = vpow2.f32 %v3174_v32 }
 0x681   : > { %4111 = vpow2.f32 %v3175_v52 }
 0x682   : > { %4113 = vtanh.f32 %v3918_v56 }
 0x689   : > { %v4108_v55 = vpop.eup %4107 }
 0x68a   : > { %v4110_v61 = vpop.eup %4109  ;;  %v2111_v1 = vadd.f32 1.0, %v4108_v55 }
 0x68b   : > { %v2117_v25 = vadd.f32 1.0, %v4110_v61  ;;  %v4112_v27 = vpop.eup %4111 }
 0x68c   : > { %4115 = vrcp.f32 %v2111_v1  ;;  %v4114_v31 = vpop.eup %4113  ;;  %v2124_v58 = vadd.f32 1.0, %v4112_v27 }
 0x68d   : > { %4117 = vrcp.f32 %v2117_v25 }
 0x68e   : > { %4119 = vrcp.f32 %v2124_v58 }
 0x696   : > { %v4116_v40 = vpop.eup %4115 }
 0x697   : > { %v4118_v42 = vpop.eup %4117  ;;  %v2129_v49 = vmul.f32 %v4116_v40, %v4114_v31  ;;  %v2640_v40 = vld [vmem:[%s4561_s3 + $0x8] sm:$0xff] }
 0x698   : > { %v2128_v62 = vmul.f32 %v4118_v42, %v5165_v13  ;;  %v4120_v30 = vpop.eup %4119  ;;  %v2644_v42 = vld [vmem:[%s4561_s3 + $0x28] sm:$0xff] }
 0x699   : > { %v3796_v58 = vpack.c.bf16 %v2644_v42, %v2640_v40 }
 0x69a   : > { %v5207_v0 = vadd.f32 %v2129_v49, %v2128_v62  ;;  %v2642_v49 = vld [vmem:[%s4561_s3 + $0x18] sm:$0xff] }
 0x69b   : > { %v2646_v62 = vld [vmem:[%s4561_s3 + $0x38] sm:$0xff] }
 0x69c   : > { %4121 = vtanh.f32 %v5207_v0 }
 0x6a6   : > { %v4122_v12 = vpop.eup %4121 }
 0x6a7   : > { %v2132_v36 = vmul.f32 %v4122_v12, %v4120_v30  ;;  %v2643_v30 = vld [vmem:[%s4561_s3 + $0x20] sm:$0xff]  ;;  %v3828_v12 = vpack.c.bf16 %v2646_v62, %v2642_v49 }
 0x6a9   : > { %2136 = vst [vmem:[#allocation2 + $0x20] sm:$0xff] %v2132_v36  ;;  %2274 = vmatmul.mubr.f32.vlgmr.msra.gmra.mrb[10].mxu0 %v2132_v36  ;;  %2345 = vmatmul.mubr.f32.vlgmr.msra.gmra.mrb[10].mxu1 %v2132_v36 }
 0x6aa   : > { %3735 = vmatpush1.bf16.msra.mxu0 %v4966_v3  ;;  %3767 = vmatpush1.bf16.msra.mxu1 %v4971_v23 }
 0x6ab   : > { %3737 = vmatprep.subr.bf16.mxu0 %v4979_v4  ;;  %3769 = vmatprep.subr.bf16.mxu1 %v4984_v15 }
 0x6ac   : > { %2520 = vmatprep.mubr.f32.mxu0 %v4340_v41  ;;  %2591 = vmatprep.mubr.f32.mxu1 %v4340_v41 }
 0x6ae   : > { %3739 = vmatpush1.bf16.msra.mxu0 %v4986_v16  ;;  %3771 = vmatpush1.bf16.msra.mxu1 %v4991_v21 }
 0x6af   : > { %3741 = vmatprep.subr.bf16.mxu0 %v5041_v35  ;;  %3773 = vmatprep.subr.bf16.mxu1 %v5046_v45 }
 0x6b2   : > { %3743 = vmatpush1.bf16.msra.mxu0 %v5048_v46  ;;  %3775 = vmatpush1.bf16.msra.mxu1 %v5053_v54 }
 0x6b3   : > { %3745 = vmatprep.subr.bf16.mxu0 %v5061_v17  ;;  %3777 = vmatprep.subr.bf16.mxu1 %v5066_v33 }
 0x6b6   : > { %3747 = vmatpush1.bf16.msra.mxu0 %v5068_v9  ;;  %3779 = vmatpush1.bf16.msra.mxu1 %v5073_v19 }
 0x6b7   : > { %3749 = vmatprep.subr.bf16.mxu0 %v5081_v44  ;;  %3781 = vmatprep.subr.bf16.mxu1 %v5086_v57 }
 0x6ba   : > { %3751 = vmatpush1.bf16.msra.mxu0 %v5088_v60  ;;  %3783 = vmatpush1.bf16.msra.mxu1 %v5093_v6 }
 0x6bb   : > { %3753 = vmatprep.subr.bf16.mxu0 %v5100_v24  ;;  %3785 = vmatprep.subr.bf16.mxu1 %v5106_v43 }
 0x6be   : > { %3755 = vmatpush1.bf16.msra.mxu0 %v5108_v48  ;;  %3787 = vmatpush1.bf16.msra.mxu1 %v5114_v11 }
 0x6bf   : > { %3757 = vmatprep.subr.bf16.mxu0 %v5120_v34  ;;  %3789 = vmatprep.subr.bf16.mxu1 %v5122_v38 }
 0x6c2   : > { %3759 = vmatpush1.bf16.msra.mxu0 %v5128_v51  ;;  %3791 = vmatpush1.bf16.msra.mxu1 %v5135_v20 }
 0x6c3   : > { %3761 = vmatprep.subr.bf16.mxu0 %v5137_v26  ;;  %3793 = vmatprep.subr.bf16.mxu1 %v5143_v8 }
 0x6c6   : > { %3763 = vmatpush1.bf16.msra.mxu0 %v5149_v50  ;;  %3795 = vmatpush1.bf16.msra.mxu1 %v5153_v53 }
 0x6c7   : > { %3797 = vmatprep.subr.bf16.mxu0 %v3796_v58  ;;  %3829 = vmatprep.subr.bf16.mxu1 %v3828_v12 }
 0x77c   : > { %v2275_v3 = vpop.f32.mrb[10].mxu0  ;;  %v2346_v23 = vpop.f32.mrb[10].mxu1 }
 0x77d   : > { %v3904_v4 = vadd.f32 %v2275_v3, %v4899_v5  ;;  %v2277_v15 = vpop.f32.mrb[11].mxu0  ;;  %v2348_v16 = vpop.f32.mrb[11].mxu1  ;;  %v3920_v63 = vadd.f32 %v2346_v23, %v4908_v29  ;;  %v2641_v3 = vld [vmem:[%s4561_s3 + $0x10] sm:$0xff] }
 0x77e   : > { %v3905_v21 = vadd.f32 %v2277_v15, %v4901_v7  ;;  %v3921_v47 = vadd.f32 %v2348_v16, %v4905_v22  ;;  %v2645_v23 = vld [vmem:[%s4561_s3 + $0x30] sm:$0xff]  ;;  %v2652_v15 = vld [vmem:[%s4561_s3 + $0x68] sm:$0xff]  ;;  %v2650_v16 = vld [vmem:[%s4561_s3 + $0x58] sm:$0xff] }
 0x77f   : > { %v3176_v13 = vmul.f32 -1.442695, %v3904_v4  ;;  %v2648_v4 = vld [vmem:[%s4561_s3 + $0x48] sm:$0xff] }
 0x780   : > { %v3177_v39 = vmul.f32 -1.442695, %v3905_v21  ;;  %v3178_v59 = vmul.f32 -1.442695, %v3921_v47  ;;  %v3800_v21 = vpack.c.bf16 %v2652_v15, %v2648_v4  ;;  %v2651_v47 = vld [vmem:[%s4561_s3 + $0x60] sm:$0xff]  ;;  %v2891_v15 = vld [vmem:[#allocation11 + $0x8] sm:$0xff] (!%p3185_p10) }
 0x781   : > { %4123 = vpow2.f32 %v3176_v13  ;;  %v2654_v13 = vld [vmem:[%s4561_s3 + $0x78] sm:$0xff]  ;;  %v2890_v4 = vld [vmem:[#allocation11] sm:$0xff] (!%p3185_p10) }
 0x782   : > { %4125 = vpow2.f32 %v3177_v39  ;;  %v2647_v39 = vld [vmem:[%s4561_s3 + $0x40] sm:$0xff] }
 0x783   : > { %4127 = vpow2.f32 %v3178_v59  ;;  %v3832_v59 = vpack.c.bf16 %v2654_v13, %v2650_v16  ;;  %v2892_v16 = vld [vmem:[#allocation11 + $0x10] sm:$0xff] (!%p3185_p10)  ;;  %v2893_v13 = vld [vmem:[#allocation11 + $0x18] sm:$0xff] (!%p3185_p10) }
 0x784   : > { %4129 = vtanh.f32 %v3920_v63  ;;  %v3802_v63 = vpack.c.bf16 %v2651_v47, %v2647_v39  ;;  %v3864_v39 = vpack.c.bf16 (!%p3185_p10), %v2893_v13, %v2892_v16  ;;  %v2894_v47 = vld [vmem:[#allocation11 + $0x20] sm:$0xff] (!%p3185_p10) }
 0x78b   : > { %v4124_v2 = vpop.eup %4123 }
 0x78c   : > { %v4126_v10 = vpop.eup %4125  ;;  %v2358_v14 = vadd.f32 1.0, %v4124_v2  ;;  %v2649_v2 = vld [vmem:[%s4561_s3 + $0x50] sm:$0xff] }
 0x78d   : > { %v2364_v18 = vadd.f32 1.0, %v4126_v10  ;;  %v4128_v28 = vpop.eup %4127  ;;  %v2653_v10 = vld [vmem:[%s4561_s3 + $0x70] sm:$0xff] }
 0x78e   : > { %4131 = vrcp.f32 %v2358_v14  ;;  %v4130_v32 = vpop.eup %4129  ;;  %v2371_v55 = vadd.f32 1.0, %v4128_v28  ;;  %v3834_v14 = vpack.c.bf16 %v2653_v10, %v2649_v2  ;;  %v2882_v2 = vld [vmem:[#allocation2] sm:$0xff] (!%p3185_p10) }
 0x78f   : > { %4133 = vrcp.f32 %v2364_v18  ;;  %v2886_v10 = vld [vmem:[#allocation2 + $0x20] sm:$0xff] (!%p3185_p10) }
 0x790   : > { %4135 = vrcp.f32 %v2371_v55 }
 0x798   : > { %v4132_v37 = vpop.eup %4131 }
 0x799   : > { %v4134_v52 = vpop.eup %4133  ;;  %v2376_v56 = vmul.f32 %v4132_v37, %v4130_v32 }
 0x79a   : > { %v2375_v61 = vmul.f32 %v4134_v52, %v5207_v0  ;;  %v4136_v25 = vpop.eup %4135  ;;  %v2639_v0 = vld [vmem:[%s4561_s3] sm:$0xff] }
 0x79b   : > { %v3798_v36 = vpack.c.bf16 %v2643_v30, %v2639_v0 }
 0x79c   : > { %v5247_v1 = vadd.f32 %v2376_v56, %v2375_v61 }
 0x79e   : > { %4137 = vtanh.f32 %v5247_v1 }
 0x7a8   : > { %v4138_v27 = vpop.eup %4137 }
 0x7a9   : > { %v2379_v31 = vmul.f32 %v4138_v27, %v4136_v25 }
 0x7ab   : > { %2383 = vst [vmem:[#allocation2 + $0x28] sm:$0xff] %v2379_v31  ;;  %2521 = vmatmul.mubr.f32.vlgmr.msra.gmra.mrb[12].mxu0 %v2379_v31  ;;  %2592 = vmatmul.mubr.f32.vlgmr.msra.gmra.mrb[12].mxu1 %v2379_v31 }
 0x7ac   : > { %2767 = vmatprep.mubr.f32.mxu0 %v4340_v41  ;;  %2838 = vmatprep.mubr.f32.mxu1 %v4340_v41  ;;  %v3830_v41 = vpack.c.bf16 %v2645_v23, %v2641_v3 }
 0x7ad   : > { %3799 = vmatpush1.bf16.msra.mxu0 %v3798_v36 }
 0x7ae   : > { %3831 = vmatpush1.bf16.msra.mxu1 %v3830_v41  ;;  %3801 = vmatprep.subr.bf16.mxu0 %v3800_v21  ;;  %v3860_v21 = vpack.c.bf16 (!%p3185_p10), %v2891_v15, %v2890_v4 }
 0x7af   : > { %3833 = vmatprep.subr.bf16.mxu1 %v3832_v59  ;;  %v2895_v59 = vld [vmem:[#allocation11 + $0x28] sm:$0xff] (!%p3185_p10) }
 0x7b1   : > { %3803 = vmatpush1.bf16.msra.mxu0 %v3802_v63  ;;  %v3868_v63 = vpack.c.bf16 (!%p3185_p10), %v2895_v59, %v2894_v47 }
 0x7b2   : > { %3835 = vmatpush1.bf16.msra.mxu1 %v3834_v14  ;;  %3805 = vmatprep.subr.bf16.mxu0 %v5041_v35  ;;  %v2896_v14 = vld [vmem:[#allocation11 + $0x30] sm:$0xff] (!%p3185_p10) }
 0x7b3   : > { %3837 = vmatprep.subr.bf16.mxu1 %v5046_v45 }
 0x7b5   : > { %3807 = vmatpush1.bf16.msra.mxu0 %v5048_v46 }
 0x7b6   : > { %3839 = vmatpush1.bf16.msra.mxu1 %v5053_v54  ;;  %3809 = vmatprep.subr.bf16.mxu0 %v5061_v17 }
 0x7b7   : > { %3841 = vmatprep.subr.bf16.mxu1 %v5066_v33 }
 0x7b9   : > { %3811 = vmatpush1.bf16.msra.mxu0 %v5068_v9 }
 0x7ba   : > { %3843 = vmatpush1.bf16.msra.mxu1 %v5073_v19  ;;  %3813 = vmatprep.subr.bf16.mxu0 %v5081_v44 }
 0x7bb   : > { %3845 = vmatprep.subr.bf16.mxu1 %v5086_v57 }
 0x7bd   : > { %3815 = vmatpush1.bf16.msra.mxu0 %v5088_v60 }
 0x7be   : > { %3847 = vmatpush1.bf16.msra.mxu1 %v5093_v6  ;;  %3817 = vmatprep.subr.bf16.mxu0 %v5100_v24 }
 0x7bf   : > { %3849 = vmatprep.subr.bf16.mxu1 %v5106_v43 }
 0x7c1   : > { %3819 = vmatpush1.bf16.msra.mxu0 %v5108_v48 }
 0x7c2   : > { %3851 = vmatpush1.bf16.msra.mxu1 %v5114_v11  ;;  %3821 = vmatprep.subr.bf16.mxu0 %v5120_v34 }
 0x7c3   : > { %3853 = vmatprep.subr.bf16.mxu1 %v5122_v38 }
 0x7c5   : > { %3823 = vmatpush1.bf16.msra.mxu0 %v5128_v51 }
 0x7c6   : > { %3855 = vmatpush1.bf16.msra.mxu1 %v5135_v20  ;;  %3825 = vmatprep.subr.bf16.mxu0 %v5137_v26 }
 0x7c7   : > { %3857 = vmatprep.subr.bf16.mxu1 %v5143_v8 }
 0x7c9   : > { %3827 = vmatpush1.bf16.msra.mxu0 %v5149_v50 }
 0x7ca   : > { %3859 = vmatpush1.bf16.msra.mxu1 %v5153_v53  ;;  %3861 = vmatprep.subr.bf16.mxu0 (!%p3185_p10), %v3860_v21 }
 0x7cb   : > { %3958 = vmatprep.subr.bf16.mxu1 (!%p3185_p10), %v3860_v21 }
 0x87e   : > { %v2522_v35 = vpop.f32.mrb[12].mxu0  ;;  %v2593_v45 = vpop.f32.mrb[12].mxu1 }
 0x87f   : > { %v3906_v46 = vadd.f32 %v2522_v35, %v4899_v5  ;;  %v2524_v54 = vpop.f32.mrb[13].mxu0  ;;  %v2595_v17 = vpop.f32.mrb[13].mxu1  ;;  %v3922_v60 = vadd.f32 %v2593_v45, %v4908_v29  ;;  %v2897_v35 = vld [vmem:[#allocation11 + $0x38] sm:$0xff] (!%p3185_p10) }
 0x880   : > { %v3907_v33 = vadd.f32 %v2524_v54, %v4901_v7  ;;  %v3923_v44 = vadd.f32 %v2595_v17, %v4905_v22  ;;  %v3872_v45 = vpack.c.bf16 (!%p3185_p10), %v2897_v35, %v2896_v14  ;;  %v2899_v54 = vld [vmem:[#allocation11 + $0x48] sm:$0xff] (!%p3185_p10) }
 0x881   : > { %v3179_v9 = vmul.f32 -1.442695, %v3906_v46  ;;  %v2898_v46 = vld [vmem:[#allocation11 + $0x40] sm:$0xff] (!%p3185_p10) }
 0x882   : > { %v3180_v19 = vmul.f32 -1.442695, %v3907_v33  ;;  %v3181_v57 = vmul.f32 -1.442695, %v3923_v44  ;;  %v3876_v17 = vpack.c.bf16 (!%p3185_p10), %v2899_v54, %v2898_v46  ;;  %v2900_v33 = vld [vmem:[#allocation11 + $0x50] sm:$0xff] (!%p3185_p10)  ;;  %v2902_v44 = vld [vmem:[#allocation11 + $0x60] sm:$0xff] (!%p3185_p10) }
 0x883   : > { %4139 = vpow2.f32 %v3179_v9  ;;  %v2901_v9 = vld [vmem:[#allocation11 + $0x58] sm:$0xff] (!%p3185_p10) }
 0x884   : > { %4141 = vpow2.f32 %v3180_v19  ;;  %v3880_v19 = vpack.c.bf16 (!%p3185_p10), %v2901_v9, %v2900_v33 }
 0x885   : > { %4143 = vpow2.f32 %v3181_v57  ;;  %v2903_v57 = vld [vmem:[#allocation11 + $0x68] sm:$0xff] (!%p3185_p10) }
 0x886   : > { %4145 = vtanh.f32 %v3922_v60  ;;  %v3884_v60 = vpack.c.bf16 (!%p3185_p10), %v2903_v57, %v2902_v44 }
 0x88d   : > { %v4140_v6 = vpop.eup %4139 }
 0x88e   : > { %v4142_v24 = vpop.eup %4141  ;;  %v2605_v43 = vadd.f32 1.0, %v4140_v6  ;;  %v2904_v6 = vld [vmem:[#allocation11 + $0x70] sm:$0xff] (!%p3185_p10) }
 0x88f   : > { %v2611_v48 = vadd.f32 1.0, %v4142_v24  ;;  %v4144_v11 = vpop.eup %4143  ;;  %v2905_v24 = vld [vmem:[#allocation11 + $0x78] sm:$0xff] (!%p3185_p10) }
 0x890   : > { %4147 = vrcp.f32 %v2605_v43  ;;  %v4146_v34 = vpop.eup %4145  ;;  %v2618_v26 = vadd.f32 1.0, %v4144_v11  ;;  %v3888_v43 = vpack.c.bf16 (!%p3185_p10), %v2905_v24, %v2904_v6  ;;  %v2887_v11 = vld [vmem:[#allocation2 + $0x28] sm:$0xff] (!%p3185_p10) }
 0x891   : > { %4149 = vrcp.f32 %v2611_v48  ;;  %v2883_v48 = vld [vmem:[#allocation2 + $0x8] sm:$0xff] (!%p3185_p10) }
 0x892   : > { %4151 = vrcp.f32 %v2618_v26  ;;  %v3186_v26 = vld [vmem:[%s5348_s7] ss:$0 sm:$0xff] (!%p3185_p10) }
 0x89a   : > { %v4148_v38 = vpop.eup %4147 }
 0x89b   : > { %v4150_v51 = vpop.eup %4149  ;;  %v2623_v20 = vmul.f32 %v4148_v38, %v4146_v34  ;;  %v2884_v34 = vld [vmem:[#allocation2 + $0x10] sm:$0xff] (!%p3185_p10) }
 0x89c   : > { %v2622_v8 = vmul.f32 %v4150_v51, %v5247_v1  ;;  %v4152_v53 = vpop.eup %4151  ;;  %v2885_v51 = vld [vmem:[#allocation2 + $0x18] sm:$0xff] (!%p3185_p10) }
 0x89e   : > { %v2624_v50 = vadd.f32 %v2623_v20, %v2622_v8 }
 0x8a0   : > { %4153 = vtanh.f32 %v2624_v50 }
 0x8aa   : > { %v4154_v18 = vpop.eup %4153 }
 0x8ab   : > { %v2626_v28 = vmul.f32 %v4154_v18, %v4152_v53 }
 0x8ad   : > { %2630 = vst [vmem:[#allocation2 + $0x30] sm:$0xff] %v2626_v28  ;;  %2768 = vmatmul.mubr.f32.vlgmr.msra.gmra.mrb[14].mxu0 %v2626_v28  ;;  %2839 = vmatmul.mubr.f32.vlgmr.msra.gmra.mrb[14].mxu1 %v2626_v28 }
 0x8ae   : > { %3863 = vmatpush3.bf16.msra.mxu0 (!%p3185_p10), %v3860_v21  ;;  %3966 = vmatpush3.bf16.msra.mxu1 (!%p3185_p10), %v3860_v21 }
 0x8af   : > { %3865 = vmatprep.subr.bf16.mxu0 (!%p3185_p10), %v3864_v39  ;;  %3959 = vmatprep.subr.bf16.mxu1 (!%p3185_p10), %v3864_v39 }
 0x8b0   : > { %3272 = vmatprep.mubr.f32.mxu0 (!%p3185_p10), %v2882_v2  ;;  %3278 = vmatprep.mubr.f32.mxu1 (!%p3185_p10), %v2886_v10 }
 0x8b2   : > { %3867 = vmatpush3.bf16.msra.mxu0 (!%p3185_p10), %v3864_v39  ;;  %3967 = vmatpush3.bf16.msra.mxu1 (!%p3185_p10), %v3864_v39 }
 0x8b3   : > { %3869 = vmatprep.subr.bf16.mxu0 (!%p3185_p10), %v3868_v63  ;;  %3960 = vmatprep.subr.bf16.mxu1 (!%p3185_p10), %v3868_v63 }
 0x8b4   : > { %v2888_v38 = vld [vmem:[#allocation2 + $0x30] sm:$0xff] (!%p3185_p10) }
 0x8b6   : > { %3871 = vmatpush3.bf16.msra.mxu0 (!%p3185_p10), %v3868_v63  ;;  %3968 = vmatpush3.bf16.msra.mxu1 (!%p3185_p10), %v3868_v63 }
 0x8b7   : > { %3873 = vmatprep.subr.bf16.mxu0 (!%p3185_p10), %v3872_v45  ;;  %3961 = vmatprep.subr.bf16.mxu1 (!%p3185_p10), %v3872_v45 }
 0x8ba   : > { %3875 = vmatpush3.bf16.msra.mxu0 (!%p3185_p10), %v3872_v45  ;;  %3969 = vmatpush3.bf16.msra.mxu1 (!%p3185_p10), %v3872_v45 }
 0x8bb   : > { %3877 = vmatprep.subr.bf16.mxu0 (!%p3185_p10), %v3876_v17  ;;  %3962 = vmatprep.subr.bf16.mxu1 (!%p3185_p10), %v3876_v17 }
 0x8be   : > { %3879 = vmatpush3.bf16.msra.mxu0 (!%p3185_p10), %v3876_v17  ;;  %3970 = vmatpush3.bf16.msra.mxu1 (!%p3185_p10), %v3876_v17 }
 0x8bf   : > { %3881 = vmatprep.subr.bf16.mxu0 (!%p3185_p10), %v3880_v19  ;;  %3963 = vmatprep.subr.bf16.mxu1 (!%p3185_p10), %v3880_v19 }
 0x8c2   : > { %3883 = vmatpush3.bf16.msra.mxu0 (!%p3185_p10), %v3880_v19  ;;  %3971 = vmatpush3.bf16.msra.mxu1 (!%p3185_p10), %v3880_v19 }
 0x8c3   : > { %3885 = vmatprep.subr.bf16.mxu0 (!%p3185_p10), %v3884_v60  ;;  %3964 = vmatprep.subr.bf16.mxu1 (!%p3185_p10), %v3884_v60 }
 0x8c6   : > { %3887 = vmatpush3.bf16.msra.mxu0 (!%p3185_p10), %v3884_v60  ;;  %3972 = vmatpush3.bf16.msra.mxu1 (!%p3185_p10), %v3884_v60 }
 0x8c7   : > { %3889 = vmatprep.subr.bf16.mxu0 (!%p3185_p10), %v3888_v43  ;;  %3965 = vmatprep.subr.bf16.mxu1 (!%p3185_p10), %v3888_v43 }
 0x8ca   : > { %3891 = vmatpush3.bf16.msra.mxu0 (!%p3185_p10), %v3888_v43  ;;  %3973 = vmatpush3.bf16.msra.mxu1 (!%p3185_p10), %v3888_v43 }
 0x8cd   : > { %3273 = vmatmul.mubr.f32.vlgmr.msra.gmra.mrb[0].mxu0 (!%p3185_p10), %v2883_v48  ;;  %3279 = vmatmul.mubr.f32.vlgmr.msra.gmra.mrb[0].mxu1 (!%p3185_p10), %v2887_v11 }
 0x8ce   : > { %3275 = vmatprep.mubr.f32.mxu0 (!%p3185_p10), %v2884_v34  ;;  %3281 = vmatprep.mubr.f32.mxu1 (!%p3185_p10), %v2888_v38 }
 0x8d1   : > { %3276 = vmatmul.mubr.f32.gmra.mrb[2].mxu0 (!%p3185_p10), %v2885_v51 }
 0x980   : > { %v2769_v32 = vpop.f32.mrb[14].mxu0  ;;  %v2840_v37 = vpop.f32.mrb[14].mxu1 }
 0x981   : > { %v3908_v52 = vadd.f32 %v2769_v32, %v4899_v5  ;;  %v2771_v56 = vpop.f32.mrb[15].mxu0  ;;  %v2842_v55 = vpop.f32.mrb[15].mxu1  ;;  %v3924_v40 = vadd.f32 %v2840_v37, %v4908_v29 }
 0x982   : > { %v3909_v61 = vadd.f32 %v2771_v56, %v4901_v7  ;;  %v3925_v1 = vadd.f32 %v2842_v55, %v4905_v22 }
 0x983   : > { %v3182_v25 = vmul.f32 -1.442695, %v3908_v52 }
 0x984   : > { %v3183_v27 = vmul.f32 -1.442695, %v3909_v61  ;;  %v3184_v31 = vmul.f32 -1.442695, %v3925_v1 }
 0x985   : > { %4155 = vpow2.f32 %v3182_v25 }
 0x986   : > { %4157 = vpow2.f32 %v3183_v27 }
 0x987   : > { %4159 = vpow2.f32 %v3184_v31 }
 0x988   : > { %4161 = vtanh.f32 %v3924_v40 }
 0x98f   : > { %v4156_v42 = vpop.eup %4155 }
 0x990   : > { %v4158_v49 = vpop.eup %4157  ;;  %v2852_v58 = vadd.f32 1.0, %v4156_v42 }
 0x991   : > { %v2858_v62 = vadd.f32 1.0, %v4158_v49  ;;  %v4160_v5 = vpop.eup %4159 }
 0x992   : > { %4163 = vrcp.f32 %v2852_v58  ;;  %v4162_v0 = vpop.eup %4161  ;;  %v2865_v36 = vadd.f32 1.0, %v4160_v5 }
 0x993   : > { %4165 = vrcp.f32 %v2858_v62 }
 0x994   : > { %4167 = vrcp.f32 %v2865_v36 }
 0x99c   : > { %v4164_v7 = vpop.eup %4163 }
 0x99d   : > { %v4166_v30 = vpop.eup %4165  ;;  %v2870_v12 = vmul.f32 %v4164_v7, %v4162_v0 }
 0x99e   : > { %v2869_v3 = vmul.f32 %v4166_v30, %v2624_v50  ;;  %v4168_v22 = vpop.eup %4167 }
 0x9a0   : > { %v2871_v23 = vadd.f32 %v2870_v12, %v2869_v3  ;;  %v3274_v8 = vpop.f32.mrb[0].mxu0 (!%p3185_p10)  ;;  %v3280_v50 = vpop.f32.mrb[0].mxu1 (!%p3185_p10) }
 0x9a1   : > { %v2985_v53 = vadd.f32 (!%p3185_p10), %v3274_v8, %v3186_v26  ;;  %v3005_v18 = vadd.f32 (!%p3185_p10), %v3280_v50, %v3186_v26  ;;  %v2979_v28 = vpop.f32.mrb[1].mxu0 (!%p3185_p10)  ;;  %v2999_v32 = vpop.f32.mrb[1].mxu1 (!%p3185_p10) }
 0x9a2   : > { %4169 = vtanh.f32 %v2871_v23  ;;  %v2980_v37 = vadd.f32 (!%p3185_p10), %v3186_v26, %v2979_v28  ;;  %v3000_v52 = vadd.f32 (!%p3185_p10), %v3186_v26, %v2999_v32 }
 0x9a3   : > { %3019 = vst [vmem:[#allocation12 + $0x8] sm:$0xff] (!%p3185_p10), %v2985_v53  ;;  %3023 = vst [vmem:[#allocation12 + $0x28] sm:$0xff] (!%p3185_p10), %v3005_v18 }
 0x9a4   : > { %3018 = vst [vmem:[#allocation12] sm:$0xff] (!%p3185_p10), %v2980_v37  ;;  %3022 = vst [vmem:[#allocation12 + $0x20] sm:$0xff] (!%p3185_p10), %v3000_v52  ;;  %v3277_v56 = vpop.f32.mrb[2].mxu0 (!%p3185_p10) }
 0x9a5   : > { %v2995_v61 = vadd.f32 (!%p3185_p10), %v3277_v56, %v3186_v26  ;;  %v2989_v27 = vpop.f32.mrb[3].mxu0 (!%p3185_p10) }
 0x9a6   : > { %v2990_v31 = vadd.f32 (!%p3185_p10), %v3186_v26, %v2989_v27 }
 0x9a7   : > { %3021 = vst [vmem:[#allocation12 + $0x18] sm:$0xff] (!%p3185_p10), %v2995_v61 }
 0x9a8   : > { %3020 = vst [vmem:[#allocation12 + $0x10] sm:$0xff] (!%p3185_p10), %v2990_v31 }
 0x9a9   : > { %2881 = sbr.rel (%p3185_p10) target bundleno = 2703 (0xa8f), region = 72 }
 0x9ac   : > { %v4170_v29 = vpop.eup %4169 }
 0x9ad   : > { %v2873_v41 = vmul.f32 %v4170_v29, %v4168_v22 }
 0x9af   : > { %2877 = vst [vmem:[#allocation2 + $0x38] sm:$0xff] %v2873_v41 }
 0x9b6   : > { %v2889_v20 = vld [vmem:[#allocation2 + $0x38] sm:$0xff] }
 0x9b7   : > { %3282 = vmatmul.mubr.f32.gmra.mrb[2].mxu1 %v2889_v20 }
 0xa8a   : > { %v3283_v55 = vpop.f32.mrb[2].mxu1 }
 0xa8b   : > { %v3015_v25 = vadd.f32 %v3283_v55, %v3186_v26  ;;  %v3009_v1 = vpop.f32.mrb[3].mxu1 }
 0xa8c   : > { %v3010_v40 = vadd.f32 %v3186_v26, %v3009_v1 }
 0xa8d   : > { %3025 = vst [vmem:[#allocation12 + $0x38] sm:$0xff] %v3015_v25 }
 0xa8e   : > { %3024 = vst [vmem:[#allocation12 + $0x30] sm:$0xff] %v3010_v40 }
 0xa8f PF: > { %p4000_p12 = scmp.eq.s32.totalorder %s4408_s9, 1  ;;  %s4341_s27 = smov [#allocation12]  }
 0xa90   : > { %s3032_s21 = sshll.u32 %s4341_s27, 4  ;;  %s3033_s21 = int_to_ptr.vmem [resolvable:$true] %s3032_s21 }
 0xa91   : > { %s4259_s24 = scalar_lea.vmem %s3033_s21, 1024  ;;  %p4266_p3 = scmp.lt.s32.totalorder %s3033_s21, %s3033_s21 }
 0xa92   : > { %p4260_p0 = scmp.ne.s32.totalorder %s3033_s21, %s4259_s24  ;;  %p4267_p9 = scmp.lt.s32.totalorder %s4259_s24, %s4259_s24 }
 0xa94   : > { %p4261_p2 = pnand %p4260_p0, %p4000_p12  ;;  %p4268_p1 = por %p4267_p9, %p4266_p3 }
 0xa96   : > { %p4262_p13 = pneg %p4261_p2 }
 0xa98   : > { %p4269_p11 = pnand %p4268_p1, %p4262_p13 }
 0xa9a   : > { %4272 = shalt.err (!%p4269_p11)
}
 0xa9b   : > { %s4273_s12 = scalar_lea.hbm %s5349_s8, 1024 }
 0xa9c   : > { %p4274_p7 = scmp.ne.s32.totalorder %s5349_s8, %s4273_s12  ;;  %p4279_p5 = scmp.lt.u32.totalorder %s4273_s12, %s5349_s8 }
 0xa9e   : > { %p4275_p8 = pnand %p4274_p7, %p4000_p12 }
 0xaa0   : > { %p4276_p4 = pneg %p4275_p8 }
 0xaa2   : > { %p4281_p6 = pnand %p4279_p5, %p4276_p4 }
 0xaa4   : > { %4284 = shalt.err (!%p4281_p6)
}
 0xaa5   : > { %s4342_s26 = smov 128   ;;  %s4343_s18 = smov 8  }
 0xaa6   : > { %3983 = dma.vmem_to_hbm [thread:$0]  (%p4000_p12), %s3033_s21, 1024, %s5349_s8, [#allocation8], %s4342_s26, %s4342_s26, %s4343_s18  }
 0xaa7   : > { %4314 = dma.done.wait (%p4000_p12), [#allocation8], 1024  }
 0xaa8   : > { %4316 = vsyncadd (%p4000_p12), [#allocation8], 4294966272 }
 0xaa9 PF: > { %p22_p10 = scmp.ge.s32.totalorder %s4434_s15, 4   ;;  %s5366_s27 = smov %s4323_s28 }
 0xaaa   : > { %s5367_s28 = smov %s4327_s29  ;;  %s5368_s29 = smov %s4460_s19 }
 0xaab   : > { %s5369_s30 = smov %s4434_s15  ;;  %24 = sbr.rel (!%p22_p10) target bundleno = 9 (0x9), region = 132 }
 0xab2   :  { %3048 = vsyncpa [#allocation7], 1 }
 0xab3   :  { %3050 = vsyncpa [#allocation7 + $0x1], 1 }
 0xab4   :  { %3051 = vsyncpa [#allocation10], 1 }
 0xab5   :  { %3053 = vsyncpa [#allocation10 + $0x1], 1 }
 0xab6   :  { %3054 = vsyncpa [#allocation8], 1 }
 0xab7   :  { %3056 = vsyncpa [#allocation8 + $0x1], 1 }

</bundles_post_ra>
